<compile_context>
chip_gen: v7x
topology: tpu7x:2x2x1
jax: 0.10.0
libtpu: 0.0.40
codegen_flags: <defaults>
</compile_context>

<pallas_src>
import math

import numpy as np
import jax
import jax.numpy as jnp
from jax.experimental import pallas as pl
from jax.experimental.pallas import tpu as pltpu

# ---------------- configuration (small, consistent with the module) ----------
BATCH = 2
LATENT_DIM = 32
MODEL_DIM = 32
NUM_TOKENS = 8
NUM_LAYERS = 2
NUM_HEADS = 4
DIM_FF = 64
HEAD_DIM = MODEL_DIM // NUM_HEADS
LN_EPS = 1e-5

B, T, D, L, H, F = BATCH, NUM_TOKENS, MODEL_DIM, LATENT_DIM, NUM_HEADS, DIM_FF
BT = B * T            # rows of the batch-folded activation matrix
BHT = B * H * T       # rows of the batch-and-head stacked K/V

assert MODEL_DIM % NUM_HEADS == 0

# ---- row offsets inside the packed slabs -------------------------------------
# const256 slab (width T*D = 256)
WPROJ_R, COLM_R, CSELT_R = 0, L, L + BT
C256_ROWS = L + BT + D
# const64 slab (width 64)
REP_R, BLK_R, HSM_R, XMASK_R, BTOK_R = 0, BHT, 2 * BHT, 3 * BHT, 3 * BHT + BT
C64_ROWS = 3 * BHT + 2 * BT
# per-layer slab (width 64)
WQ_R, WK_R, WV_R, WO_R, W1_R, W2T_R, VEC_R = 0, D, 2 * D, 3 * D, 4 * D, 5 * D, 6 * D
WL_ROWS = 6 * D + 10


# ---------------- fused forward kernel ----------------------------------------
def fused_encoder_kernel(x_ref, c256_ref, c64_ref, wl_ref, o_ref):
    f32 = jnp.float32

    def dot(a, b):
        return jnp.dot(a, b, preferred_element_type=f32)

    def dot_t(a, b):  # a @ b.T
        return jax.lax.dot_general(a, b, (((1,), (1,)), ((), ())),
                                   preferred_element_type=f32)

    # ---- host-precomputed constants (static ref slices; no iota/concat) ------
    wproj = c256_ref[WPROJ_R:WPROJ_R + L, :]         # (L, T*D) token projection weight
    colm = c256_ref[COLM_R:COLM_R + BT, :]           # (BT, T*D) token column mask
    cselt = c256_ref[CSELT_R:CSELT_R + D, :]         # (D, T*D) column gather (transposed)
    rep = c64_ref[REP_R:REP_R + BHT, 0:BT]           # (BHT, BT) 0/1 row replication
    blk = c64_ref[BLK_R:BLK_R + BHT, 0:BHT]          # (BHT, BHT) per-(batch,head) block ones
    hsm = c64_ref[HSM_R:HSM_R + BHT, 0:D]            # (BHT, D) head block-diagonal mask
    xmask = c64_ref[XMASK_R:XMASK_R + BT, 0:BHT]     # (BT, BHT) 0 / -1e30 cross-batch mask
    btok = c64_ref[BTOK_R:BTOK_R + BT, 0:D]          # (BT, D) proj bias + positional enc

    # ---- token projection: x (B, L) -> h (B*T, D), batch-major rows ----------
    x = x_ref[...]                                                       # (B, L)
    xrep = jnp.concatenate(
        [jnp.broadcast_to(x[b:b + 1, :], (T, L)) for b in range(B)], axis=0)  # (BT, L)
    y0 = dot(xrep, wproj)                  # (BT, T*D): row (b,t) = full projection of x[b]
    h = dot_t(y0 * colm, cselt) + btok     # pick columns t*D:(t+1)*D per row -> (BT, D)

    # ---- encoder layers (post-norm, relu FFN, no mask, dropout = identity) ---
    for li in range(NUM_LAYERS):
        wq = wl_ref[li, WQ_R:WQ_R + D, 0:D]      # 1/sqrt(dh) pre-folded
        wk = wl_ref[li, WK_R:WK_R + D, 0:D]
        wv = wl_ref[li, WV_R:WV_R + D, 0:D]
        wo = wl_ref[li, WO_R:WO_R + D, 0:D]
        w1 = wl_ref[li, W1_R:W1_R + D, 0:F]
        w2t = wl_ref[li, W2T_R:W2T_R + D, 0:F]
        vec = wl_ref[li, VEC_R:VEC_R + 10, :]    # packed bias / LN vectors
        bq, bk, bv = vec[0:1, 0:D], vec[1:2, 0:D], vec[2:3, 0:D]
        bo, g1, be1 = vec[3:4, 0:D], vec[4:5, 0:D], vec[5:6, 0:D]
        b1 = vec[6:7, 0:F]
        b2, g2, be2 = vec[7:8, 0:D], vec[8:9, 0:D], vec[9:10, 0:D]

        # -- self-attention: all batches and heads in one block-diagonal set ---
        q = dot(h, wq) + bq                          # (BT, D)
        hrep = dot(rep, h)                           # (BHT, D) rows (b,h,t) <- h[b*T+t]
        kstk = (dot(hrep, wk) + bk) * hsm            # (BHT, D) head-block-diagonal K
        vstk = (dot(hrep, wv) + bv) * hsm            # (BHT, D) head-block-diagonal V
        s = dot_t(q, kstk) + xmask                   # (BT, BHT); cross-batch cols -> -1e30
        # shared per-row max across heads: exact math; see clamp below for the
        # (trained-weights) underflow corner case.
        s = s - jnp.max(s, axis=-1, keepdims=True)
        p = jnp.exp(s)                               # masked columns become exactly 0
        denom = dot(p, blk)                          # per-(batch,head) softmax denominators
        denom = jnp.maximum(denom, 1e-30)            # all-zero blocks: 0 * (1/eps) = 0, not NaN
        pn = p * pl.reciprocal(denom, approx=True)
        attn = dot(pn, vstk)                         # (BT, D), heads land in own columns
        attn = dot(attn, wo) + bo

        # -- residual + layernorm 1 --
        x1 = h + attn
        mu1 = jnp.mean(x1, axis=-1, keepdims=True)
        var1 = jnp.mean((x1 - mu1) ** 2, axis=-1, keepdims=True)
        y = (x1 - mu1) * jax.lax.rsqrt(var1 + LN_EPS) * g1 + be1

        # -- feed-forward (relu), batch folded into M --
        hf = jnp.maximum(dot(y, w1) + b1, 0.0)
        ff = dot_t(hf, w2t) + b2

        # -- residual + layernorm 2 --
        x2 = y + ff
        mu2 = jnp.mean(x2, axis=-1, keepdims=True)
        var2 = jnp.mean((x2 - mu2) ** 2, axis=-1, keepdims=True)
        h = (x2 - mu2) * jax.lax.rsqrt(var2 + LN_EPS) * g2 + be2

    # ---- direct store: (B*T, D); wrapper reshapes to (B, T, D) ---------------
    o_ref[...] = h


# ---------------- wrapper ------------------------------------------------------
def _full_spec(shape):
    nd = len(shape)
    return pl.BlockSpec(shape, lambda i, _nd=nd: (0,) * _nd)


def transformer_encoder_forward(x, kp):
    """x: [B, latent_dim] -> [B, num_tokens, model_dim]; one fused pallas_call."""
    args = (x, kp["c256"], kp["c64"], kp["wmats"])
    out = pl.pallas_call(
        fused_encoder_kernel,
        out_shape=jax.ShapeDtypeStruct((BT, D), jnp.float32),
        grid=(1,),
        in_specs=[_full_spec(a.shape) for a in args],
        out_specs=pl.BlockSpec((BT, D), lambda i: (0, 0)),
        compiler_params=pltpu.CompilerParams(dimension_semantics=("arbitrary",)),
    )(*args)
    return out.reshape(B, T, D)


# ---------------- parameter init (reference layout, as in PyTorch) ------------
def init_params(key):
    ks = jax.random.split(key, 4 + NUM_LAYERS)
    p = {}
    p["proj_w_t"] = 0.02 * jax.random.normal(ks[0], (LATENT_DIM, MODEL_DIM * NUM_TOKENS), jnp.float32)
    p["proj_b"] = 0.01 * jax.random.normal(ks[1], (1, MODEL_DIM * NUM_TOKENS), jnp.float32)
    p["pos"] = jax.random.normal(ks[2], (NUM_TOKENS, MODEL_DIM), jnp.float32)

    layers = []
    for li in range(NUM_LAYERS):
        lk = jax.random.split(ks[4 + li], 8)
        wqkv_t = 0.02 * jax.random.normal(lk[0], (MODEL_DIM, 3 * MODEL_DIM), jnp.float32)
        bqkv = 0.01 * jax.random.normal(lk[1], (1, 3 * MODEL_DIM), jnp.float32)
        wo_t = 0.02 * jax.random.normal(lk[2], (MODEL_DIM, MODEL_DIM), jnp.float32)
        bo = 0.01 * jax.random.normal(lk[3], (1, MODEL_DIM), jnp.float32)
        g1 = jnp.ones((1, MODEL_DIM), jnp.float32)
        be1 = jnp.zeros((1, MODEL_DIM), jnp.float32)
        w1_t = 0.02 * jax.random.normal(lk[4], (MODEL_DIM, DIM_FF), jnp.float32)
        b1 = 0.01 * jax.random.normal(lk[5], (1, DIM_FF), jnp.float32)
        w2_t = 0.02 * jax.random.normal(lk[6], (DIM_FF, MODEL_DIM), jnp.float32)
        b2 = 0.01 * jax.random.normal(lk[7], (1, MODEL_DIM), jnp.float32)
        g2 = jnp.ones((1, MODEL_DIM), jnp.float32)
        be2 = jnp.zeros((1, MODEL_DIM), jnp.float32)
        layers.append((wqkv_t, bqkv, wo_t, bo, g1, be1, w1_t, b1, w2_t, b2, g2, be2))
    p["layers"] = layers
    return p


# ---------------- one-time parameter + constant packing for the fused kernel --
def prepare_kernel_params(params):
    scale = 1.0 / math.sqrt(HEAD_DIM)

    def padc(a, w=64):
        a = np.asarray(a, np.float32)
        return np.pad(a, ((0, 0), (0, w - a.shape[1])))

    # ---- width-256 slab: wproj | colmask | cselT -----------------------------
    wproj = np.asarray(params["proj_w_t"], np.float32)                    # (L, T*D)
    i_bt = np.arange(BT)
    c = np.arange(T * D)
    d_idx = np.arange(D)
    colmask = (c[None, :] // D == (i_bt % T)[:, None]).astype(np.float32)  # (BT, T*D)
    cselt = (c[None, :] % D == d_idx[:, None]).astype(np.float32)          # (D, T*D)
    c256 = np.concatenate([wproj, colmask, cselt], axis=0)
    assert c256.shape == (C256_ROWS, T * D)

    # ---- width-64 slab: rep | blk_ones | head_mask | cross_mask | bias_tok ---
    r = np.arange(BHT)
    rb, rh, rt = r // (H * T), (r // T) % H, r % T
    rep = np.zeros((BHT, BT), np.float32)
    rep[r, rb * T + rt] = 1.0
    blk = ((r[:, None] // T) == (r[None, :] // T)).astype(np.float32)      # (BHT, BHT)
    hsm = (d_idx[None, :] // HEAD_DIM == rh[:, None]).astype(np.float32)   # (BHT, D)
    xmask = np.where((i_bt // T)[:, None] == rb[None, :],
                     0.0, -1e30).astype(np.float32)                        # (BT, BHT)
    btok = np.tile(np.asarray(params["proj_b"], np.float32).reshape(T, D)
                   + np.asarray(params["pos"], np.float32), (B, 1))        # (BT, D)
    c64 = np.concatenate([padc(rep), blk, padc(hsm), padc(xmask), padc(btok)], axis=0)
    assert c64.shape == (C64_ROWS, 64)

    # ---- per-layer slab: wq|wk|wv|wo|w1|w2^T rows + 10 bias/LN vector rows ----
    wls = []
    for (wqkv_t, bqkv, wo_t, bo, g1, be1, w1_t, b1, w2_t, b2, g2, be2) in params["layers"]:
        wqkv_t = np.asarray(wqkv_t, np.float32)
        bqkv = np.asarray(bqkv, np.float32)
        wq = wqkv_t[:, 0:D] * scale               # 1/sqrt(head_dim) folded (init-time)
        wk = wqkv_t[:, D:2 * D]
        wv = wqkv_t[:, 2 * D:3 * D]
        bq = bqkv[:, 0:D] * scale
        bk = bqkv[:, D:2 * D]
        bv = bqkv[:, 2 * D:3 * D]
        w2T = np.asarray(w2_t, np.float32).T      # (D, F)
        mats = [padc(wq), padc(wk), padc(wv), padc(np.asarray(wo_t, np.float32)),
                padc(np.asarray(w1_t, np.float32)), padc(w2T)]
        vecs = [padc(bq), padc(bk), padc(bv), padc(np.asarray(bo, np.float32)),
                padc(np.asarray(g1, np.float32)), padc(np.asarray(be1, np.float32)),
                padc(np.asarray(b1, np.float32)), padc(np.asarray(b2, np.float32)),
                padc(np.asarray(g2, np.float32)), padc(np.asarray(be2, np.float32))]
        wls.append(np.concatenate(mats + vecs, axis=0))
    wmats = np.stack(wls)
    assert wmats.shape == (NUM_LAYERS, WL_ROWS, 64)

    return dict(c256=jnp.asarray(c256), c64=jnp.asarray(c64), wmats=jnp.asarray(wmats))


# ---------------- pure-JAX reference (for correctness check) ------------------
def reference_forward(x, params):
    Bx = x.shape[0]
    tok = x @ params["proj_w_t"] + params["proj_b"]
    tok = tok.reshape(Bx, NUM_TOKENS, MODEL_DIM) + params["pos"][None]
    for (wqkv_t, bqkv, wo_t, bo, g1, be1, w1_t, b1, w2_t, b2, g2, be2) in params["layers"]:
        qkv = tok @ wqkv_t + bqkv
        q, k, v = jnp.split(qkv, 3, axis=-1)
        qh = q.reshape(Bx, NUM_TOKENS, NUM_HEADS, HEAD_DIM).transpose(0, 2, 1, 3)
        kh = k.reshape(Bx, NUM_TOKENS, NUM_HEADS, HEAD_DIM).transpose(0, 2, 1, 3)
        vh = v.reshape(Bx, NUM_TOKENS, NUM_HEADS, HEAD_DIM).transpose(0, 2, 1, 3)
        s = jnp.einsum("bhqd,bhkd->bhqk", qh, kh) / math.sqrt(HEAD_DIM)
        pattn = jax.nn.softmax(s, axis=-1)
        o = jnp.einsum("bhqk,bhkd->bhqd", pattn, vh).transpose(0, 2, 1, 3).reshape(
            Bx, NUM_TOKENS, MODEL_DIM)
        attn = o @ wo_t + bo
        x1 = tok + attn
        mu = x1.mean(-1, keepdims=True)
        var = ((x1 - mu) ** 2).mean(-1, keepdims=True)
        y = (x1 - mu) / jnp.sqrt(var + LN_EPS) * g1 + be1
        f = jnp.maximum(y @ w1_t + b1, 0.0) @ w2_t + b2
        x2 = y + f
        mu2 = x2.mean(-1, keepdims=True)
        var2 = ((x2 - mu2) ** 2).mean(-1, keepdims=True)
        tok = (x2 - mu2) / jnp.sqrt(var2 + LN_EPS) * g2 + be2
    return tok


# ---------------- main ----------------------------------------------------------
if __name__ == "__main__":
    key = jax.random.PRNGKey(0)
    pkey, xkey = jax.random.split(key)
    params = init_params(pkey)
    kparams = prepare_kernel_params(params)
    x = jax.random.normal(xkey, (BATCH, LATENT_DIM), jnp.float32)

    out = transformer_encoder_forward(x, kparams)
    out = jax.block_until_ready(out)

    ref = reference_forward(x, params)
    assert out.shape == (BATCH, NUM_TOKENS, MODEL_DIM)
    # tolerance relaxed slightly vs exact math because the softmax denominator
    # uses the EUP approximate reciprocal (pl.reciprocal(approx=True)).
    assert jnp.allclose(out, ref, atol=5e-3, rtol=5e-3), "Pallas output mismatch vs reference"

    print("KERNEL_OK")
</pallas_src>

<mosaic_0001>
module attributes {stable_mosaic.version = 11 : i64} {
  func.func @fused_encoder_kernel(%arg0: i32, %arg1: memref<2x32xf32, #tpu.memory_space<vmem>>, %arg2: memref<80x256xf32, #tpu.memory_space<vmem>>, %arg3: memref<224x64xf32, #tpu.memory_space<vmem>>, %arg4: memref<2x202x64xf32, #tpu.memory_space<vmem>>, %arg5: memref<16x32xf32, #tpu.memory_space<vmem>>) attributes {dimension_semantics = [#tpu.dimension_semantics<arbitrary>], iteration_bounds = array<i64: 1>, scalar_prefetch = 0 : i64, scratch_operands = 0 : i64, tpu.core_type = #tpu.core_type<tc>, window_params = [{pipeline_mode = #tpu.pipeline_mode<synchronous>, transform_indices = @transform_0, window_bounds = array<i64: 2, 32>}, {pipeline_mode = #tpu.pipeline_mode<synchronous>, transform_indices = @transform_1, window_bounds = array<i64: 80, 256>}, {pipeline_mode = #tpu.pipeline_mode<synchronous>, transform_indices = @transform_2, window_bounds = array<i64: 224, 64>}, {pipeline_mode = #tpu.pipeline_mode<synchronous>, transform_indices = @transform_3, window_bounds = array<i64: 2, 202, 64>}, {pipeline_mode = #tpu.pipeline_mode<synchronous>, transform_indices = @transform_4, window_bounds = array<i64: 16, 32>}]} {
    %c0 = arith.constant 0 : index
    %c0_0 = arith.constant 0 : index
    %0 = vector.load %arg2[%c0, %c0_0] : memref<80x256xf32, #tpu.memory_space<vmem>>, vector<32x256xf32>
    %c32 = arith.constant 32 : index
    %c0_1 = arith.constant 0 : index
    %1 = vector.load %arg2[%c32, %c0_1] : memref<80x256xf32, #tpu.memory_space<vmem>>, vector<16x256xf32>
    %c48 = arith.constant 48 : index
    %c0_2 = arith.constant 0 : index
    %2 = vector.load %arg2[%c48, %c0_2] : memref<80x256xf32, #tpu.memory_space<vmem>>, vector<32x256xf32>
    %c0_3 = arith.constant 0 : index
    %c0_4 = arith.constant 0 : index
    %3 = vector.load %arg3[%c0_3, %c0_4] : memref<224x64xf32, #tpu.memory_space<vmem>>, vector<64x16xf32>
    %c64 = arith.constant 64 : index
    %c0_5 = arith.constant 0 : index
    %4 = vector.load %arg3[%c64, %c0_5] : memref<224x64xf32, #tpu.memory_space<vmem>>, vector<64x64xf32>
    %c128 = arith.constant 128 : index
    %c0_6 = arith.constant 0 : index
    %5 = vector.load %arg3[%c128, %c0_6] : memref<224x64xf32, #tpu.memory_space<vmem>>, vector<64x32xf32>
    %c192 = arith.constant 192 : index
    %c0_7 = arith.constant 0 : index
    %6 = vector.load %arg3[%c192, %c0_7] : memref<224x64xf32, #tpu.memory_space<vmem>>, vector<16x64xf32>
    %c208 = arith.constant 208 : index
    %c0_8 = arith.constant 0 : index
    %7 = vector.load %arg3[%c208, %c0_8] : memref<224x64xf32, #tpu.memory_space<vmem>>, vector<16x32xf32>
    %c0_9 = arith.constant 0 : index
    %c0_10 = arith.constant 0 : index
    %8 = vector.load %arg1[%c0_9, %c0_10] : memref<2x32xf32, #tpu.memory_space<vmem>>, vector<2x32xf32>
    %9 = vector.extract_strided_slice %8 {offsets = [0, 0], sizes = [1, 32], strides = [1, 1]} : vector<2x32xf32> to vector<1x32xf32>
    %10 = vector.shape_cast %9 : vector<1x32xf32> to vector<1x32xf32>
    %11 = vector.broadcast %10 : vector<1x32xf32> to vector<8x32xf32>
    %12 = vector.extract_strided_slice %8 {offsets = [1, 0], sizes = [1, 32], strides = [1, 1]} : vector<2x32xf32> to vector<1x32xf32>
    %13 = vector.shape_cast %12 : vector<1x32xf32> to vector<1x32xf32>
    %14 = vector.broadcast %13 : vector<1x32xf32> to vector<8x32xf32>
    %15 = tpu.concatenate %11, %14 in 0 : vector<8x32xf32>, vector<8x32xf32> -> vector<16x32xf32>
    %cst = arith.constant dense<0.000000e+00> : vector<16x256xf32>
    %16 = tpu.matmul %15, %0, %cst {dimension_numbers = #tpu.dot_dimension_numbers<[1], [0], [0], [1], [0, 0, 1, 1], [], []>} : vector<16x32xf32>, vector<32x256xf32>, vector<16x256xf32> -> vector<16x256xf32>
    %17 = arith.mulf %16, %1 : vector<16x256xf32>
    %cst_11 = arith.constant dense<0.000000e+00> : vector<16x32xf32>
    %18 = tpu.matmul %17, %2, %cst_11 {dimension_numbers = #tpu.dot_dimension_numbers<[1], [1], [0], [0], [0, 0, 1, 0], [], []>} : vector<16x256xf32>, vector<32x256xf32>, vector<16x32xf32> -> vector<16x32xf32>
    %19 = arith.addf %18, %7 : vector<16x32xf32>
    %c0_12 = arith.constant 0 : index
    %c0_13 = arith.constant 0 : index
    %c0_14 = arith.constant 0 : index
    %20 = vector.load %arg4[%c0_12, %c0_13, %c0_14] : memref<2x202x64xf32, #tpu.memory_space<vmem>>, vector<1x32x32xf32>
    %21 = vector.shape_cast %20 : vector<1x32x32xf32> to vector<32x32xf32>
    %c0_15 = arith.constant 0 : index
    %c32_16 = arith.constant 32 : index
    %c0_17 = arith.constant 0 : index
    %22 = vector.load %arg4[%c0_15, %c32_16, %c0_17] : memref<2x202x64xf32, #tpu.memory_space<vmem>>, vector<1x32x32xf32>
    %23 = vector.shape_cast %22 : vector<1x32x32xf32> to vector<32x32xf32>
    %c0_18 = arith.constant 0 : index
    %c64_19 = arith.constant 64 : index
    %c0_20 = arith.constant 0 : index
    %24 = vector.load %arg4[%c0_18, %c64_19, %c0_20] : memref<2x202x64xf32, #tpu.memory_space<vmem>>, vector<1x32x32xf32>
    %25 = vector.shape_cast %24 : vector<1x32x32xf32> to vector<32x32xf32>
    %c0_21 = arith.constant 0 : index
    %c96 = arith.constant 96 : index
    %c0_22 = arith.constant 0 : index
    %26 = vector.load %arg4[%c0_21, %c96, %c0_22] : memref<2x202x64xf32, #tpu.memory_space<vmem>>, vector<1x32x32xf32>
    %27 = vector.shape_cast %26 : vector<1x32x32xf32> to vector<32x32xf32>
    %c0_23 = arith.constant 0 : index
    %c128_24 = arith.constant 128 : index
    %c0_25 = arith.constant 0 : index
    %28 = vector.load %arg4[%c0_23, %c128_24, %c0_25] : memref<2x202x64xf32, #tpu.memory_space<vmem>>, vector<1x32x64xf32>
    %29 = vector.shape_cast %28 : vector<1x32x64xf32> to vector<32x64xf32>
    %c0_26 = arith.constant 0 : index
    %c160 = arith.constant 160 : index
    %c0_27 = arith.constant 0 : index
    %30 = vector.load %arg4[%c0_26, %c160, %c0_27] : memref<2x202x64xf32, #tpu.memory_space<vmem>>, vector<1x32x64xf32>
    %31 = vector.shape_cast %30 : vector<1x32x64xf32> to vector<32x64xf32>
    %c0_28 = arith.constant 0 : index
    %c192_29 = arith.constant 192 : index
    %c0_30 = arith.constant 0 : index
    %32 = vector.load %arg4[%c0_28, %c192_29, %c0_30] : memref<2x202x64xf32, #tpu.memory_space<vmem>>, vector<1x10x64xf32>
    %33 = vector.shape_cast %32 : vector<1x10x64xf32> to vector<10x64xf32>
    %34 = vector.extract_strided_slice %33 {offsets = [0, 0], sizes = [1, 32], strides = [1, 1]} : vector<10x64xf32> to vector<1x32xf32>
    %35 = vector.extract_strided_slice %33 {offsets = [1, 0], sizes = [1, 32], strides = [1, 1]} : vector<10x64xf32> to vector<1x32xf32>
    %36 = vector.extract_strided_slice %33 {offsets = [2, 0], sizes = [1, 32], strides = [1, 1]} : vector<10x64xf32> to vector<1x32xf32>
    %37 = vector.extract_strided_slice %33 {offsets = [3, 0], sizes = [1, 32], strides = [1, 1]} : vector<10x64xf32> to vector<1x32xf32>
    %38 = vector.extract_strided_slice %33 {offsets = [4, 0], sizes = [1, 32], strides = [1, 1]} : vector<10x64xf32> to vector<1x32xf32>
    %39 = vector.extract_strided_slice %33 {offsets = [5, 0], sizes = [1, 32], strides = [1, 1]} : vector<10x64xf32> to vector<1x32xf32>
    %40 = vector.extract_strided_slice %33 {offsets = [6, 0], sizes = [1, 64], strides = [1, 1]} : vector<10x64xf32> to vector<1x64xf32>
    %41 = vector.extract_strided_slice %33 {offsets = [7, 0], sizes = [1, 32], strides = [1, 1]} : vector<10x64xf32> to vector<1x32xf32>
    %42 = vector.extract_strided_slice %33 {offsets = [8, 0], sizes = [1, 32], strides = [1, 1]} : vector<10x64xf32> to vector<1x32xf32>
    %43 = vector.extract_strided_slice %33 {offsets = [9, 0], sizes = [1, 32], strides = [1, 1]} : vector<10x64xf32> to vector<1x32xf32>
    %cst_31 = arith.constant dense<0.000000e+00> : vector<16x32xf32>
    %44 = tpu.matmul %19, %21, %cst_31 {dimension_numbers = #tpu.dot_dimension_numbers<[1], [0], [0], [1], [0, 0, 1, 1], [], []>} : vector<16x32xf32>, vector<32x32xf32>, vector<16x32xf32> -> vector<16x32xf32>
    %45 = vector.broadcast %34 : vector<1x32xf32> to vector<16x32xf32>
    %46 = arith.addf %44, %45 : vector<16x32xf32>
    %cst_32 = arith.constant dense<0.000000e+00> : vector<64x32xf32>
    %47 = tpu.matmul %3, %19, %cst_32 {dimension_numbers = #tpu.dot_dimension_numbers<[1], [0], [0], [1], [0, 0, 1, 1], [], []>} : vector<64x16xf32>, vector<16x32xf32>, vector<64x32xf32> -> vector<64x32xf32>
    %cst_33 = arith.constant dense<0.000000e+00> : vector<64x32xf32>
    %48 = tpu.matmul %47, %23, %cst_33 {dimension_numbers = #tpu.dot_dimension_numbers<[1], [0], [0], [1], [0, 0, 1, 1], [], []>} : vector<64x32xf32>, vector<32x32xf32>, vector<64x32xf32> -> vector<64x32xf32>
    %49 = vector.broadcast %35 : vector<1x32xf32> to vector<64x32xf32>
    %50 = arith.addf %48, %49 : vector<64x32xf32>
    %51 = arith.mulf %50, %5 : vector<64x32xf32>
    %cst_34 = arith.constant dense<0.000000e+00> : vector<64x32xf32>
    %52 = tpu.matmul %47, %25, %cst_34 {dimension_numbers = #tpu.dot_dimension_numbers<[1], [0], [0], [1], [0, 0, 1, 1], [], []>} : vector<64x32xf32>, vector<32x32xf32>, vector<64x32xf32> -> vector<64x32xf32>
    %53 = vector.broadcast %36 : vector<1x32xf32> to vector<64x32xf32>
    %54 = arith.addf %52, %53 : vector<64x32xf32>
    %55 = arith.mulf %54, %5 : vector<64x32xf32>
    %cst_35 = arith.constant dense<0.000000e+00> : vector<16x64xf32>
    %56 = tpu.matmul %46, %51, %cst_35 {dimension_numbers = #tpu.dot_dimension_numbers<[1], [1], [0], [0], [0, 0, 1, 0], [], []>} : vector<16x32xf32>, vector<64x32xf32>, vector<16x64xf32> -> vector<16x64xf32>
    %57 = arith.addf %56, %6 : vector<16x64xf32>
    %cst_36 = arith.constant dense<0xFF800000> : vector<16xf32>
    %58 = vector.multi_reduction <maximumf>, %57, %cst_36 [1] : vector<16x64xf32> to vector<16xf32>
    %59 = vector.shape_cast %58 : vector<16xf32> to vector<16x1xf32>
    %60 = vector.broadcast %59 : vector<16x1xf32> to vector<16x64xf32>
    %61 = arith.subf %57, %60 : vector<16x64xf32>
    %62 = math.exp %61 : vector<16x64xf32>
    %cst_37 = arith.constant dense<0.000000e+00> : vector<16x64xf32>
    %63 = tpu.matmul %62, %4, %cst_37 {dimension_numbers = #tpu.dot_dimension_numbers<[1], [0], [0], [1], [0, 0, 1, 1], [], []>} : vector<16x64xf32>, vector<64x64xf32>, vector<16x64xf32> -> vector<16x64xf32>
    %cst_38 = arith.constant 1.000000e-30 : f32
    %64 = vector.broadcast %cst_38 : f32 to vector<16x64xf32>
    %65 = arith.maximumf %63, %64 : vector<16x64xf32>
    %66 = tpu.reciprocal %65 {approx = true} : vector<16x64xf32> -> vector<16x64xf32>
    %67 = arith.mulf %62, %66 : vector<16x64xf32>
    %cst_39 = arith.constant dense<0.000000e+00> : vector<16x32xf32>
    %68 = tpu.matmul %67, %55, %cst_39 {dimension_numbers = #tpu.dot_dimension_numbers<[1], [0], [0], [1], [0, 0, 1, 1], [], []>} : vector<16x64xf32>, vector<64x32xf32>, vector<16x32xf32> -> vector<16x32xf32>
    %cst_40 = arith.constant dense<0.000000e+00> : vector<16x32xf32>
    %69 = tpu.matmul %68, %27, %cst_40 {dimension_numbers = #tpu.dot_dimension_numbers<[1], [0], [0], [1], [0, 0, 1, 1], [], []>} : vector<16x32xf32>, vector<32x32xf32>, vector<16x32xf32> -> vector<16x32xf32>
    %70 = vector.broadcast %37 : vector<1x32xf32> to vector<16x32xf32>
    %71 = arith.addf %69, %70 : vector<16x32xf32>
    %72 = arith.addf %19, %71 : vector<16x32xf32>
    %cst_41 = arith.constant dense<0.000000e+00> : vector<16xf32>
    %73 = vector.multi_reduction <add>, %72, %cst_41 [1] : vector<16x32xf32> to vector<16xf32>
    %74 = vector.shape_cast %73 : vector<16xf32> to vector<16x1xf32>
    %cst_42 = arith.constant 3.200000e+01 : f32
    %75 = vector.broadcast %cst_42 : f32 to vector<16x1xf32>
    %76 = arith.divf %74, %75 : vector<16x1xf32>
    %77 = vector.broadcast %76 : vector<16x1xf32> to vector<16x32xf32>
    %78 = arith.subf %72, %77 : vector<16x32xf32>
    %79 = arith.mulf %78, %78 : vector<16x32xf32>
    %cst_43 = arith.constant dense<0.000000e+00> : vector<16xf32>
    %80 = vector.multi_reduction <add>, %79, %cst_43 [1] : vector<16x32xf32> to vector<16xf32>
    %81 = vector.shape_cast %80 : vector<16xf32> to vector<16x1xf32>
    %cst_44 = arith.constant 3.200000e+01 : f32
    %82 = vector.broadcast %cst_44 : f32 to vector<16x1xf32>
    %83 = arith.divf %81, %82 : vector<16x1xf32>
    %84 = vector.broadcast %76 : vector<16x1xf32> to vector<16x32xf32>
    %85 = arith.subf %72, %84 : vector<16x32xf32>
    %cst_45 = arith.constant 9.99999974E-6 : f32
    %86 = vector.broadcast %cst_45 : f32 to vector<16x1xf32>
    %87 = arith.addf %83, %86 : vector<16x1xf32>
    %88 = math.rsqrt %87 : vector<16x1xf32>
    %89 = vector.broadcast %88 : vector<16x1xf32> to vector<16x32xf32>
    %90 = arith.mulf %85, %89 : vector<16x32xf32>
    %91 = vector.broadcast %38 : vector<1x32xf32> to vector<16x32xf32>
    %92 = arith.mulf %90, %91 : vector<16x32xf32>
    %93 = vector.broadcast %39 : vector<1x32xf32> to vector<16x32xf32>
    %94 = arith.addf %92, %93 : vector<16x32xf32>
    %cst_46 = arith.constant dense<0.000000e+00> : vector<16x64xf32>
    %95 = tpu.matmul %94, %29, %cst_46 {dimension_numbers = #tpu.dot_dimension_numbers<[1], [0], [0], [1], [0, 0, 1, 1], [], []>} : vector<16x32xf32>, vector<32x64xf32>, vector<16x64xf32> -> vector<16x64xf32>
    %96 = vector.broadcast %40 : vector<1x64xf32> to vector<16x64xf32>
    %97 = arith.addf %95, %96 : vector<16x64xf32>
    %cst_47 = arith.constant 0.000000e+00 : f32
    %98 = vector.broadcast %cst_47 : f32 to vector<16x64xf32>
    %99 = arith.maximumf %97, %98 : vector<16x64xf32>
    %cst_48 = arith.constant dense<0.000000e+00> : vector<16x32xf32>
    %100 = tpu.matmul %99, %31, %cst_48 {dimension_numbers = #tpu.dot_dimension_numbers<[1], [1], [0], [0], [0, 0, 1, 0], [], []>} : vector<16x64xf32>, vector<32x64xf32>, vector<16x32xf32> -> vector<16x32xf32>
    %101 = vector.broadcast %41 : vector<1x32xf32> to vector<16x32xf32>
    %102 = arith.addf %100, %101 : vector<16x32xf32>
    %103 = arith.addf %94, %102 : vector<16x32xf32>
    %cst_49 = arith.constant dense<0.000000e+00> : vector<16xf32>
    %104 = vector.multi_reduction <add>, %103, %cst_49 [1] : vector<16x32xf32> to vector<16xf32>
    %105 = vector.shape_cast %104 : vector<16xf32> to vector<16x1xf32>
    %cst_50 = arith.constant 3.200000e+01 : f32
    %106 = vector.broadcast %cst_50 : f32 to vector<16x1xf32>
    %107 = arith.divf %105, %106 : vector<16x1xf32>
    %108 = vector.broadcast %107 : vector<16x1xf32> to vector<16x32xf32>
    %109 = arith.subf %103, %108 : vector<16x32xf32>
    %110 = arith.mulf %109, %109 : vector<16x32xf32>
    %cst_51 = arith.constant dense<0.000000e+00> : vector<16xf32>
    %111 = vector.multi_reduction <add>, %110, %cst_51 [1] : vector<16x32xf32> to vector<16xf32>
    %112 = vector.shape_cast %111 : vector<16xf32> to vector<16x1xf32>
    %cst_52 = arith.constant 3.200000e+01 : f32
    %113 = vector.broadcast %cst_52 : f32 to vector<16x1xf32>
    %114 = arith.divf %112, %113 : vector<16x1xf32>
    %115 = vector.broadcast %107 : vector<16x1xf32> to vector<16x32xf32>
    %116 = arith.subf %103, %115 : vector<16x32xf32>
    %cst_53 = arith.constant 9.99999974E-6 : f32
    %117 = vector.broadcast %cst_53 : f32 to vector<16x1xf32>
    %118 = arith.addf %114, %117 : vector<16x1xf32>
    %119 = math.rsqrt %118 : vector<16x1xf32>
    %120 = vector.broadcast %119 : vector<16x1xf32> to vector<16x32xf32>
    %121 = arith.mulf %116, %120 : vector<16x32xf32>
    %122 = vector.broadcast %42 : vector<1x32xf32> to vector<16x32xf32>
    %123 = arith.mulf %121, %122 : vector<16x32xf32>
    %124 = vector.broadcast %43 : vector<1x32xf32> to vector<16x32xf32>
    %125 = arith.addf %123, %124 : vector<16x32xf32>
    %c1 = arith.constant 1 : index
    %c0_54 = arith.constant 0 : index
    %c0_55 = arith.constant 0 : index
    %126 = vector.load %arg4[%c1, %c0_54, %c0_55] : memref<2x202x64xf32, #tpu.memory_space<vmem>>, vector<1x32x32xf32>
    %127 = vector.shape_cast %126 : vector<1x32x32xf32> to vector<32x32xf32>
    %c1_56 = arith.constant 1 : index
    %c32_57 = arith.constant 32 : index
    %c0_58 = arith.constant 0 : index
    %128 = vector.load %arg4[%c1_56, %c32_57, %c0_58] : memref<2x202x64xf32, #tpu.memory_space<vmem>>, vector<1x32x32xf32>
    %129 = vector.shape_cast %128 : vector<1x32x32xf32> to vector<32x32xf32>
    %c1_59 = arith.constant 1 : index
    %c64_60 = arith.constant 64 : index
    %c0_61 = arith.constant 0 : index
    %130 = vector.load %arg4[%c1_59, %c64_60, %c0_61] : memref<2x202x64xf32, #tpu.memory_space<vmem>>, vector<1x32x32xf32>
    %131 = vector.shape_cast %130 : vector<1x32x32xf32> to vector<32x32xf32>
    %c1_62 = arith.constant 1 : index
    %c96_63 = arith.constant 96 : index
    %c0_64 = arith.constant 0 : index
    %132 = vector.load %arg4[%c1_62, %c96_63, %c0_64] : memref<2x202x64xf32, #tpu.memory_space<vmem>>, vector<1x32x32xf32>
    %133 = vector.shape_cast %132 : vector<1x32x32xf32> to vector<32x32xf32>
    %c1_65 = arith.constant 1 : index
    %c128_66 = arith.constant 128 : index
    %c0_67 = arith.constant 0 : index
    %134 = vector.load %arg4[%c1_65, %c128_66, %c0_67] : memref<2x202x64xf32, #tpu.memory_space<vmem>>, vector<1x32x64xf32>
    %135 = vector.shape_cast %134 : vector<1x32x64xf32> to vector<32x64xf32>
    %c1_68 = arith.constant 1 : index
    %c160_69 = arith.constant 160 : index
    %c0_70 = arith.constant 0 : index
    %136 = vector.load %arg4[%c1_68, %c160_69, %c0_70] : memref<2x202x64xf32, #tpu.memory_space<vmem>>, vector<1x32x64xf32>
    %137 = vector.shape_cast %136 : vector<1x32x64xf32> to vector<32x64xf32>
    %c1_71 = arith.constant 1 : index
    %c192_72 = arith.constant 192 : index
    %c0_73 = arith.constant 0 : index
    %138 = vector.load %arg4[%c1_71, %c192_72, %c0_73] : memref<2x202x64xf32, #tpu.memory_space<vmem>>, vector<1x10x64xf32>
    %139 = vector.shape_cast %138 : vector<1x10x64xf32> to vector<10x64xf32>
    %140 = vector.extract_strided_slice %139 {offsets = [0, 0], sizes = [1, 32], strides = [1, 1]} : vector<10x64xf32> to vector<1x32xf32>
    %141 = vector.extract_strided_slice %139 {offsets = [1, 0], sizes = [1, 32], strides = [1, 1]} : vector<10x64xf32> to vector<1x32xf32>
    %142 = vector.extract_strided_slice %139 {offsets = [2, 0], sizes = [1, 32], strides = [1, 1]} : vector<10x64xf32> to vector<1x32xf32>
    %143 = vector.extract_strided_slice %139 {offsets = [3, 0], sizes = [1, 32], strides = [1, 1]} : vector<10x64xf32> to vector<1x32xf32>
    %144 = vector.extract_strided_slice %139 {offsets = [4, 0], sizes = [1, 32], strides = [1, 1]} : vector<10x64xf32> to vector<1x32xf32>
    %145 = vector.extract_strided_slice %139 {offsets = [5, 0], sizes = [1, 32], strides = [1, 1]} : vector<10x64xf32> to vector<1x32xf32>
    %146 = vector.extract_strided_slice %139 {offsets = [6, 0], sizes = [1, 64], strides = [1, 1]} : vector<10x64xf32> to vector<1x64xf32>
    %147 = vector.extract_strided_slice %139 {offsets = [7, 0], sizes = [1, 32], strides = [1, 1]} : vector<10x64xf32> to vector<1x32xf32>
    %148 = vector.extract_strided_slice %139 {offsets = [8, 0], sizes = [1, 32], strides = [1, 1]} : vector<10x64xf32> to vector<1x32xf32>
    %149 = vector.extract_strided_slice %139 {offsets = [9, 0], sizes = [1, 32], strides = [1, 1]} : vector<10x64xf32> to vector<1x32xf32>
    %cst_74 = arith.constant dense<0.000000e+00> : vector<16x32xf32>
    %150 = tpu.matmul %125, %127, %cst_74 {dimension_numbers = #tpu.dot_dimension_numbers<[1], [0], [0], [1], [0, 0, 1, 1], [], []>} : vector<16x32xf32>, vector<32x32xf32>, vector<16x32xf32> -> vector<16x32xf32>
    %151 = vector.broadcast %140 : vector<1x32xf32> to vector<16x32xf32>
    %152 = arith.addf %150, %151 : vector<16x32xf32>
    %cst_75 = arith.constant dense<0.000000e+00> : vector<64x32xf32>
    %153 = tpu.matmul %3, %125, %cst_75 {dimension_numbers = #tpu.dot_dimension_numbers<[1], [0], [0], [1], [0, 0, 1, 1], [], []>} : vector<64x16xf32>, vector<16x32xf32>, vector<64x32xf32> -> vector<64x32xf32>
    %cst_76 = arith.constant dense<0.000000e+00> : vector<64x32xf32>
    %154 = tpu.matmul %153, %129, %cst_76 {dimension_numbers = #tpu.dot_dimension_numbers<[1], [0], [0], [1], [0, 0, 1, 1], [], []>} : vector<64x32xf32>, vector<32x32xf32>, vector<64x32xf32> -> vector<64x32xf32>
    %155 = vector.broadcast %141 : vector<1x32xf32> to vector<64x32xf32>
    %156 = arith.addf %154, %155 : vector<64x32xf32>
    %157 = arith.mulf %156, %5 : vector<64x32xf32>
    %cst_77 = arith.constant dense<0.000000e+00> : vector<64x32xf32>
    %158 = tpu.matmul %153, %131, %cst_77 {dimension_numbers = #tpu.dot_dimension_numbers<[1], [0], [0], [1], [0, 0, 1, 1], [], []>} : vector<64x32xf32>, vector<32x32xf32>, vector<64x32xf32> -> vector<64x32xf32>
    %159 = vector.broadcast %142 : vector<1x32xf32> to vector<64x32xf32>
    %160 = arith.addf %158, %159 : vector<64x32xf32>
    %161 = arith.mulf %160, %5 : vector<64x32xf32>
    %cst_78 = arith.constant dense<0.000000e+00> : vector<16x64xf32>
    %162 = tpu.matmul %152, %157, %cst_78 {dimension_numbers = #tpu.dot_dimension_numbers<[1], [1], [0], [0], [0, 0, 1, 0], [], []>} : vector<16x32xf32>, vector<64x32xf32>, vector<16x64xf32> -> vector<16x64xf32>
    %163 = arith.addf %162, %6 : vector<16x64xf32>
    %cst_79 = arith.constant dense<0xFF800000> : vector<16xf32>
    %164 = vector.multi_reduction <maximumf>, %163, %cst_79 [1] : vector<16x64xf32> to vector<16xf32>
    %165 = vector.shape_cast %164 : vector<16xf32> to vector<16x1xf32>
    %166 = vector.broadcast %165 : vector<16x1xf32> to vector<16x64xf32>
    %167 = arith.subf %163, %166 : vector<16x64xf32>
    %168 = math.exp %167 : vector<16x64xf32>
    %cst_80 = arith.constant dense<0.000000e+00> : vector<16x64xf32>
    %169 = tpu.matmul %168, %4, %cst_80 {dimension_numbers = #tpu.dot_dimension_numbers<[1], [0], [0], [1], [0, 0, 1, 1], [], []>} : vector<16x64xf32>, vector<64x64xf32>, vector<16x64xf32> -> vector<16x64xf32>
    %cst_81 = arith.constant 1.000000e-30 : f32
    %170 = vector.broadcast %cst_81 : f32 to vector<16x64xf32>
    %171 = arith.maximumf %169, %170 : vector<16x64xf32>
    %172 = tpu.reciprocal %171 {approx = true} : vector<16x64xf32> -> vector<16x64xf32>
    %173 = arith.mulf %168, %172 : vector<16x64xf32>
    %cst_82 = arith.constant dense<0.000000e+00> : vector<16x32xf32>
    %174 = tpu.matmul %173, %161, %cst_82 {dimension_numbers = #tpu.dot_dimension_numbers<[1], [0], [0], [1], [0, 0, 1, 1], [], []>} : vector<16x64xf32>, vector<64x32xf32>, vector<16x32xf32> -> vector<16x32xf32>
    %cst_83 = arith.constant dense<0.000000e+00> : vector<16x32xf32>
    %175 = tpu.matmul %174, %133, %cst_83 {dimension_numbers = #tpu.dot_dimension_numbers<[1], [0], [0], [1], [0, 0, 1, 1], [], []>} : vector<16x32xf32>, vector<32x32xf32>, vector<16x32xf32> -> vector<16x32xf32>
    %176 = vector.broadcast %143 : vector<1x32xf32> to vector<16x32xf32>
    %177 = arith.addf %175, %176 : vector<16x32xf32>
    %178 = arith.addf %125, %177 : vector<16x32xf32>
    %cst_84 = arith.constant dense<0.000000e+00> : vector<16xf32>
    %179 = vector.multi_reduction <add>, %178, %cst_84 [1] : vector<16x32xf32> to vector<16xf32>
    %180 = vector.shape_cast %179 : vector<16xf32> to vector<16x1xf32>
    %cst_85 = arith.constant 3.200000e+01 : f32
    %181 = vector.broadcast %cst_85 : f32 to vector<16x1xf32>
    %182 = arith.divf %180, %181 : vector<16x1xf32>
    %183 = vector.broadcast %182 : vector<16x1xf32> to vector<16x32xf32>
    %184 = arith.subf %178, %183 : vector<16x32xf32>
    %185 = arith.mulf %184, %184 : vector<16x32xf32>
    %cst_86 = arith.constant dense<0.000000e+00> : vector<16xf32>
    %186 = vector.multi_reduction <add>, %185, %cst_86 [1] : vector<16x32xf32> to vector<16xf32>
    %187 = vector.shape_cast %186 : vector<16xf32> to vector<16x1xf32>
    %cst_87 = arith.constant 3.200000e+01 : f32
    %188 = vector.broadcast %cst_87 : f32 to vector<16x1xf32>
    %189 = arith.divf %187, %188 : vector<16x1xf32>
    %190 = vector.broadcast %182 : vector<16x1xf32> to vector<16x32xf32>
    %191 = arith.subf %178, %190 : vector<16x32xf32>
    %cst_88 = arith.constant 9.99999974E-6 : f32
    %192 = vector.broadcast %cst_88 : f32 to vector<16x1xf32>
    %193 = arith.addf %189, %192 : vector<16x1xf32>
    %194 = math.rsqrt %193 : vector<16x1xf32>
    %195 = vector.broadcast %194 : vector<16x1xf32> to vector<16x32xf32>
    %196 = arith.mulf %191, %195 : vector<16x32xf32>
    %197 = vector.broadcast %144 : vector<1x32xf32> to vector<16x32xf32>
    %198 = arith.mulf %196, %197 : vector<16x32xf32>
    %199 = vector.broadcast %145 : vector<1x32xf32> to vector<16x32xf32>
    %200 = arith.addf %198, %199 : vector<16x32xf32>
    %cst_89 = arith.constant dense<0.000000e+00> : vector<16x64xf32>
    %201 = tpu.matmul %200, %135, %cst_89 {dimension_numbers = #tpu.dot_dimension_numbers<[1], [0], [0], [1], [0, 0, 1, 1], [], []>} : vector<16x32xf32>, vector<32x64xf32>, vector<16x64xf32> -> vector<16x64xf32>
    %202 = vector.broadcast %146 : vector<1x64xf32> to vector<16x64xf32>
    %203 = arith.addf %201, %202 : vector<16x64xf32>
    %cst_90 = arith.constant 0.000000e+00 : f32
    %204 = vector.broadcast %cst_90 : f32 to vector<16x64xf32>
    %205 = arith.maximumf %203, %204 : vector<16x64xf32>
    %cst_91 = arith.constant dense<0.000000e+00> : vector<16x32xf32>
    %206 = tpu.matmul %205, %137, %cst_91 {dimension_numbers = #tpu.dot_dimension_numbers<[1], [1], [0], [0], [0, 0, 1, 0], [], []>} : vector<16x64xf32>, vector<32x64xf32>, vector<16x32xf32> -> vector<16x32xf32>
    %207 = vector.broadcast %147 : vector<1x32xf32> to vector<16x32xf32>
    %208 = arith.addf %206, %207 : vector<16x32xf32>
    %209 = arith.addf %200, %208 : vector<16x32xf32>
    %cst_92 = arith.constant dense<0.000000e+00> : vector<16xf32>
    %210 = vector.multi_reduction <add>, %209, %cst_92 [1] : vector<16x32xf32> to vector<16xf32>
    %211 = vector.shape_cast %210 : vector<16xf32> to vector<16x1xf32>
    %cst_93 = arith.constant 3.200000e+01 : f32
    %212 = vector.broadcast %cst_93 : f32 to vector<16x1xf32>
    %213 = arith.divf %211, %212 : vector<16x1xf32>
    %214 = vector.broadcast %213 : vector<16x1xf32> to vector<16x32xf32>
    %215 = arith.subf %209, %214 : vector<16x32xf32>
    %216 = arith.mulf %215, %215 : vector<16x32xf32>
    %cst_94 = arith.constant dense<0.000000e+00> : vector<16xf32>
    %217 = vector.multi_reduction <add>, %216, %cst_94 [1] : vector<16x32xf32> to vector<16xf32>
    %218 = vector.shape_cast %217 : vector<16xf32> to vector<16x1xf32>
    %cst_95 = arith.constant 3.200000e+01 : f32
    %219 = vector.broadcast %cst_95 : f32 to vector<16x1xf32>
    %220 = arith.divf %218, %219 : vector<16x1xf32>
    %221 = vector.broadcast %213 : vector<16x1xf32> to vector<16x32xf32>
    %222 = arith.subf %209, %221 : vector<16x32xf32>
    %cst_96 = arith.constant 9.99999974E-6 : f32
    %223 = vector.broadcast %cst_96 : f32 to vector<16x1xf32>
    %224 = arith.addf %220, %223 : vector<16x1xf32>
    %225 = math.rsqrt %224 : vector<16x1xf32>
    %226 = vector.broadcast %225 : vector<16x1xf32> to vector<16x32xf32>
    %227 = arith.mulf %222, %226 : vector<16x32xf32>
    %228 = vector.broadcast %148 : vector<1x32xf32> to vector<16x32xf32>
    %229 = arith.mulf %227, %228 : vector<16x32xf32>
    %230 = vector.broadcast %149 : vector<1x32xf32> to vector<16x32xf32>
    %231 = arith.addf %229, %230 : vector<16x32xf32>
    %c0_97 = arith.constant 0 : index
    %c0_98 = arith.constant 0 : index
    %232 = vector.load %arg5[%c0_97, %c0_98] : memref<16x32xf32, #tpu.memory_space<vmem>>, vector<16x32xf32>
    tpu.vector_store %arg5[%c0_97, %c0_98], %231 {strides = array<i32>} : memref<16x32xf32, #tpu.memory_space<vmem>>, vector<16x32xf32>,
    return
  }
  func.func @transform_0(%arg0: i32) -> (i32, i32) {
    %c0_i32 = arith.constant 0 : i32
    %c0_i32_0 = arith.constant 0 : i32
    %c0_i32_1 = arith.constant 0 : i32
    return %c0_i32, %c0_i32_0 : i32, i32
  }
  func.func @transform_1(%arg0: i32) -> (i32, i32) {
    %c0_i32 = arith.constant 0 : i32
    %c0_i32_0 = arith.constant 0 : i32
    %c0_i32_1 = arith.constant 0 : i32
    return %c0_i32, %c0_i32_0 : i32, i32
  }
  func.func @transform_2(%arg0: i32) -> (i32, i32) {
    %c0_i32 = arith.constant 0 : i32
    %c0_i32_0 = arith.constant 0 : i32
    %c0_i32_1 = arith.constant 0 : i32
    return %c0_i32, %c0_i32_0 : i32, i32
  }
  func.func @transform_3(%arg0: i32) -> (i32, i32, i32) {
    %c0_i32 = arith.constant 0 : i32
    %c0_i32_0 = arith.constant 0 : i32
    %c0_i32_1 = arith.constant 0 : i32
    %c0_i32_2 = arith.constant 0 : i32
    return %c0_i32, %c0_i32_0, %c0_i32_1 : i32, i32, i32
  }
  func.func @transform_4(%arg0: i32) -> (i32, i32) {
    %c0_i32 = arith.constant 0 : i32
    %c0_i32_0 = arith.constant 0 : i32
    %c0_i32_1 = arith.constant 0 : i32
    return %c0_i32, %c0_i32_0 : i32, i32
  }
}

</mosaic_0001>

<bundles_post_ra>
// kernel: tpu_custom_call.1
= control target key start
LH: loop header
LB: loop body
LE: loop exit
PB: predicated region body
PF: predicated region fallthrough
CT: control target
= control target key end

     0   :  { %v67_v3 = vlaneseq  ;;  %v3420_v8 = vmov 0.0   ;;  %s4138_s0 = inlined_call_operand.vmem [shape: f32[2,32], index: 0, kind: input, shape index: {}]   ;;  %s4139_s1 = inlined_call_operand.vmem [shape: f32[80,256], index: 1, kind: input, shape index: {}]   ;;  %s4140_s2 = inlined_call_operand.vmem [shape: f32[224,64], index: 2, kind: input, shape index: {}]   ;;  %s4141_s3 = inlined_call_operand.vmem [shape: f32[2,202,64], index: 3, kind: input, shape index: {}]   ;;  %s4142_s4 = inlined_call_operand.hbm [shape: f32[16,32], index: 4, kind: output, shape index: {}]  }
   0x1   :  { %v19_v0 = vld [vmem:[%s4139_s1 + $0x8] sm:$0xff]  ;;  %v21_v1 = vld [vmem:[%s4139_s1 + $0x18] sm:$0xff]  ;;  %v18_v2 = vld [vmem:[%s4139_s1] sm:$0xff]  ;;  %146 = vmatprep.mubr.f32.mxu0 %v3420_v8 }
   0x2   :  { %v3118_v4 = vpack.c.bf16 %v21_v1, %v19_v0  ;;  %v20_v5 = vld [vmem:[%s4139_s1 + $0x10] sm:$0xff]  ;;  %v23_v6 = vld [vmem:[%s4139_s1 + $0x28] sm:$0xff]  ;;  %v25_v7 = vld [vmem:[%s4139_s1 + $0x38] sm:$0xff]  ;;  %v3476_v14 = vshrl.u32 %v67_v3, 7 }
   0x3   :  { %v3120_v9 = vpack.c.bf16 %v20_v5, %v18_v2  ;;  %v3122_v10 = vpack.c.bf16 %v25_v7, %v23_v6  ;;  %v22_v11 = vld [vmem:[%s4139_s1 + $0x20] sm:$0xff]  ;;  %v24_v12 = vld [vmem:[%s4139_s1 + $0x30] sm:$0xff]  ;;  %v31_v15 = vld [vmem:[%s4139_s1 + $0x68] sm:$0xff] }
   0x4   :  { %v66_v13 = vld [vmem:[%s4138_s0] sm:$0x3]  ;;  %3119 = vmatprep.subr.bf16.mxu0 %v3118_v4  ;;  %v33_v16 = vld [vmem:[%s4139_s1 + $0x78] sm:$0xff]  ;;  %v3124_v18 = vpack.c.bf16 %v24_v12, %v22_v11  ;;  %v3488_v19 = vsub.s32 0, %v3476_v14  ;;  %v32_v21 = vld [vmem:[%s4139_s1 + $0x70] sm:$0xff] }
   0x5   :  { %v30_v17 = vld [vmem:[%s4139_s1 + $0x60] sm:$0xff]  ;;  %3121 = vmatpush1.bf16.msra.mxu0 %v3120_v9  ;;  %v3126_v20 = vpack.c.bf16 %v33_v16, %v31_v15  ;;  %v35_v22 = vld [vmem:[%s4139_s1 + $0x88] sm:$0xff]  ;;  %v37_v23 = vld [vmem:[%s4139_s1 + $0x98] sm:$0xff] }
   0x6   :  { %3123 = vmatprep.subr.bf16.mxu0 %v3122_v10  ;;  %v3128_v24 = vpack.c.bf16 %v32_v21, %v30_v17  ;;  %v3130_v25 = vpack.c.bf16 %v37_v23, %v35_v22 }
   0x7   :  { %3127 = vmatprep.subr.bf16.mxu1 %v3126_v20 }
   0x8   :  { %9 = vsyncpa [#allocation3], 0  ;;  %v70_v26 = vrot.slane %v66_v13, %v3488_v19  ;;  %v3501_v27 = vsub.s32 1, %v3476_v14  ;;  %3129 = vmatpush1.bf16.xpose.msra.mxu1 %v3128_v24  ;;  %vm75_vm0 = vcmask 261120   ;;  %v34_v28 = vld [vmem:[%s4139_s1 + $0x80] sm:$0xff]  ;;  %v36_v29 = vld [vmem:[%s4139_s1 + $0x90] sm:$0xff] }
   0x9   :  { %3125 = vmatpush1.bf16.msra.mxu0 %v3124_v18  ;;  %3131 = vmatprep.subr.bf16.mxu1 %v3130_v25  ;;  %v3132_v31 = vpack.c.bf16 %v36_v29, %v34_v28  ;;  %v238_v32 = vld [vmem:[%s4141_s3] sm:$0xff]  ;;  %v239_v33 = vld [vmem:[%s4141_s3 + $0x8] sm:$0xff]  ;;  %v29_v41 = vld [vmem:[%s4139_s1 + $0x58] sm:$0xff]  ;;  %vm349_vm1 = vcmask 130048   ;;  %vm842_vm3 = vcmask 523264   ;;  %s3421_s19 = smov [#allocation2]  }
   0xa   :  { %v74_v30 = vrot.slane %v66_v13, %v3501_v27  ;;  %v3134_v34 = vpack.c.bf16 %v239_v33, %v238_v32  ;;  %v27_v35 = vld [vmem:[%s4139_s1 + $0x48] sm:$0xff]  ;;  %v26_v36 = vld [vmem:[%s4139_s1 + $0x40] sm:$0xff]  ;;  %v28_v42 = vld [vmem:[%s4139_s1 + $0x50] sm:$0xff]  ;;  %s2489_s20 = sshll.u32 %s3421_s19, 4  ;;  %s2490_s20 = int_to_ptr.vmem [resolvable:$true] %s2489_s20 }
   0xb   :  { %v240_v47 = vld [vmem:[%s4141_s3 + $0x10] sm:$0xff]  ;;  %v241_v48 = vld [vmem:[%s4141_s3 + $0x18] sm:$0xff]  ;;  %v3551_v58 = vld [vmem:[%s4140_s2] sm:$0xff]  ;;  %p3401_p1 = scmp.lt.s32.totalorder %s2490_s20, %s2490_s20 }
   0xc   :  { %2500 = vmatmul.mubr.msk.f32.vlgmr.msra.gmra.mrb[0].mxu0 %vm75_vm0, %v70_v26  ;;  %3135 = vmatprep.subr.bf16.mxu0 %v3134_v34  ;;  %v3138_v49 = vpack.c.bf16 %v241_v48, %v240_v47  ;;  %v64_v50 = vld [vmem:[%s4140_s2 + $0xd0] sm:$0xff]  ;;  %v65_v54 = vld [vmem:[%s4140_s2 + $0xd8] sm:$0xff]  ;;  %v3562_v60 = vld [vmem:[%s4140_s2 + $0x8] sm:$0xff] }
   0xd   :  { %152 = vmatprep.mubr.f32.mxu0 %v3420_v8  ;;  %3137 = vmatpush3.bf16.msra.mxu0 %v3134_v34  ;;  %v3567_v61 = vld [vmem:[%s4140_s2 + $0x10] sm:$0xff]  ;;  %v3576_v62 = vld [vmem:[%s4140_s2 + $0x18] sm:$0xff]  ;;  %v3581_v63 = vld [vmem:[%s4140_s2 + $0x20] sm:$0xff] }
   0xe   :  { %3139 = vmatprep.subr.bf16.mxu0 %v3138_v49  ;;  %v3590_v0 = vld [vmem:[%s4140_s2 + $0x28] sm:$0xff]  ;;  %v3595_v1 = vld [vmem:[%s4140_s2 + $0x30] sm:$0xff]  ;;  %v3604_v2 = vld [vmem:[%s4140_s2 + $0x38] sm:$0xff] }
   0xf   :  { %v242_v3 = vld [vmem:[%s4141_s3 + $0x20] sm:$0xff]  ;;  %v243_v4 = vld [vmem:[%s4141_s3 + $0x28] sm:$0xff]  ;;  %v244_v9 = vld [vmem:[%s4141_s3 + $0x30] sm:$0xff] }
  0x10   :  { %2501 = vmatmul.mubr.msk.f32.gmra.mrb[2].mxu0 %vm75_vm0, %v74_v30  ;;  %3133 = vmatpush1.bf16.xpose.msra.mxu1 %v3132_v31  ;;  %v246_v5 = vld [vmem:[%s4141_s3 + $0x40] sm:$0xff]  ;;  %v3146_v6 = vpack.c.bf16 %v243_v4, %v242_v3  ;;  %v247_v7 = vld [vmem:[%s4141_s3 + $0x48] sm:$0xff]  ;;  %v245_v10 = vld [vmem:[%s4141_s3 + $0x38] sm:$0xff] }
  0x11   :  { %3141 = vmatpush3.bf16.msra.mxu0 %v3138_v49  ;;  %v3154_v8 = vpack.c.bf16 %v247_v7, %v246_v5  ;;  %v248_v11 = vld [vmem:[%s4141_s3 + $0x50] sm:$0xff]  ;;  %v3150_v12 = vpack.c.bf16 %v245_v10, %v244_v9  ;;  %v249_v13 = vld [vmem:[%s4141_s3 + $0x58] sm:$0xff]  ;;  %v46_v16 = vld [vmem:[%s4140_s2 + $0x40] sm:$0xff] }
  0x12   :  { %3147 = vmatprep.subr.bf16.mxu1 %v3146_v6  ;;  %v3158_v15 = vpack.c.bf16 %v249_v13, %v248_v11  ;;  %v47_v17 = vld [vmem:[%s4140_s2 + $0x48] sm:$0xff]  ;;  %v3644_v20 = vld [vmem:[%s4141_s3 + $0xc0] sm:$0xff]  ;;  %v48_v25 = vld [vmem:[%s4140_s2 + $0x50] sm:$0xff] }
  0x13   :  { %v3638_v18 = vpack.c.bf16 %v47_v17, %v46_v16  ;;  %v267_v21 = vrot.slane %v3644_v20, %v3488_v19  ;;  %v49_v26 = vld [vmem:[%s4140_s2 + $0x58] sm:$0xff]  ;;  %v3707_v47 = vld [vmem:[%s4140_s2 + $0x88] sm:$0xff]  ;;  %vm3730_vm2 = vmpackc.low %vm75_vm0, %vm75_vm0 }
  0x14   :  { %v3656_v30 = vpack.c.bf16 %v49_v26, %v48_v25  ;;  %v3721_v7 = vld [vmem:[%s4140_s2 + $0x98] sm:$0xff]  ;;  %vm3850_vm4 = vmpackc.low %vm842_vm3, %vm842_vm3 }
  0xdf   :  { %v148_v37 = vpop.f32.mrb[0].mxu0 }
  0xe0   :  { %v150_v38 = vpop.f32.mrb[1].mxu0  ;;  %v159_v40 = vmul.f32 %v148_v37, %v26_v36 }
  0xe1   :  { %v160_v39 = vmul.f32 %v150_v38, %v27_v35  ;;  %v50_v38 = vld [vmem:[%s4140_s2 + $0x60] sm:$0xff] }
  0xe3   :  { %v154_v43 = vpop.f32.mrb[2].mxu0  ;;  %227 = vmatprep.mubr.f32.mxu1 %v160_v39  ;;  %v51_v39 = vld [vmem:[%s4140_s2 + $0x68] sm:$0xff] }
  0xe4   :  { %v156_v44 = vpop.f32.mrb[3].mxu0  ;;  %228 = vmatmul.mubr.f32.vlgmr.msra.gmra.mrb[0].mxu1 %v159_v40  ;;  %v161_v46 = vmul.f32 %v154_v43, %v28_v42  ;;  %v3684_v40 = vpack.c.bf16 %v51_v39, %v50_v38  ;;  %v53_v42 = vld [vmem:[%s4140_s2 + $0x78] sm:$0xff] }
  0xe5   :  { %v162_v45 = vmul.f32 %v156_v44, %v29_v41  ;;  %3149 = vmatpush3.bf16.msra.mxu1 %v3146_v6  ;;  %v52_v41 = vld [vmem:[%s4140_s2 + $0x70] sm:$0xff]  ;;  %v622_v44 = vsub.s32 2, %v3476_v14 }
  0xe6   :  { %3151 = vmatprep.subr.bf16.mxu1 %v3150_v12  ;;  %v3694_v43 = vpack.c.bf16 %v53_v42, %v52_v41 }
  0xe7   :  { %232 = vmatprep.mubr.f32.mxu1 %v162_v45  ;;  %v482_v45 = vrot.slane %v3644_v20, %v3501_v27 }
  0xe8   :  { %233 = vmatmul.mubr.f32.gmra.mrb[2].mxu1 %v161_v46  ;;  %v623_v46 = vrot.slane %v3644_v20, %v622_v44 }
  0xe9   :  { %3153 = vmatpush3.bf16.msra.mxu1 %v3150_v12  ;;  %v3726_v12 = vld [vmem:[%s4140_s2 + $0x90] sm:$0xff] }
 0x1b7   :  { %v229_v51 = vpop.f32.mrb[0].mxu1 }
 0x1b8   :  { %v3539_v52 = vadd.f32 %v229_v51, %v64_v50  ;;  %v231_v53 = vpop.f32.mrb[1].mxu1 }
 0x1b9   :  { %v3712_v53 = vld [vmem:[%s4140_s2 + $0x80] sm:$0xff] }
 0x1ba   :  { %2812 = vmatprep.mubr.msk.f32.mxu0 %vm75_vm0, %v3539_v52 }
 0x1bb   :  { %v234_v55 = vpop.f32.mrb[2].mxu1 }
 0x1bc   :  { %v3546_v56 = vadd.f32 %v234_v55, %v65_v54  ;;  %v236_v57 = vpop.f32.mrb[3].mxu1 }
 0x1be   :  { %2813 = vmatmul.mubr.msk.f32.vlgmr.msra.gmra.mrb[4].mxu0 %vm75_vm0, %v3546_v56  ;;  %v3142_v59 = vpack.c.bf16 %v3546_v56, %v3539_v52 }
 0x1bf   :  { %2819 = vmatprep.mubr.msk.f32.mxu0 %vm349_vm1, %v3551_v58 }
 0x1c0   :  { %3143 = vmatprep.subr.bf16.mxu0 %v3142_v59 }
 0x1c1   :  { %3145 = vmatpush3.bf16.msra.mxu0 %v3142_v59 }
 0x1c2   :  { %3155 = vmatprep.subr.bf16.mxu0 %v3154_v8 }
 0x1c4   :  { %2820 = vmatmul.mubr.msk.f32.vlgmr.msra.gmra.mrb[6].mxu0 %vm349_vm1, %v3562_v60 }
 0x1c5   :  { %2822 = vmatprep.mubr.msk.f32.mxu0 %vm349_vm1, %v3567_v61  ;;  %3157 = vmatpush3.bf16.msra.mxu0 %v3154_v8 }
 0x1c6   :  { %3159 = vmatprep.subr.bf16.mxu0 %v3158_v15 }
 0x1c8   :  { %2823 = vmatmul.mubr.msk.f32.gmra.mrb[8].mxu0 %vm349_vm1, %v3576_v62 }
 0x1c9   :  { %2825 = vmatprep.mubr.msk.f32.mxu0 %vm349_vm1, %v3581_v63  ;;  %3161 = vmatpush3.bf16.msra.mxu0 %v3158_v15 }
 0x1ca   :  { %3187 = vmatprep.subr.bf16.mxu0 %v3638_v18 }
 0x1cc   :  { %2826 = vmatmul.mubr.msk.f32.gmra.mrb[10].mxu0 %vm349_vm1, %v3590_v0 }
 0x1cd   :  { %2828 = vmatprep.mubr.msk.f32.mxu0 %vm349_vm1, %v3595_v1 }
 0x1d0   :  { %2829 = vmatmul.mubr.msk.f32.gmra.mrb[12].mxu0 %vm349_vm1, %v3604_v2 }
 0x291   :  { %v2814_v22 = vpop.f32.mrb[4].mxu0 }
 0x292   :  { %v3648_v23 = vadd.f32 %v2814_v22, %v267_v21  ;;  %v340_v24 = vpop.f32.mrb[5].mxu0 }
 0x293   :  { %v341_v37 = vadd.f32 %v340_v24, %v267_v21 }
 0x297   :  { %v2821_v28 = vpop.f32.mrb[6].mxu0 }
 0x298   :  { %v440_v29 = vpop.f32.mrb[7].mxu0 }
 0x299   :  { %2839 = vmatprep.mubr.msk.f32.mxu1 %vm75_vm0, %v440_v29  ;;  %2859 = vmatprep.mubr.msk.f32.mxu0 %vm75_vm0, %v440_v29 }
 0x29a   :  { %2840 = vmatmul.mubr.msk.f32.vlgmr.msra.gmra.mrb[4].mxu1 %vm75_vm0, %v2821_v28  ;;  %2860 = vmatmul.mubr.msk.f32.vlgmr.msra.gmra.mrb[14].mxu0 %vm75_vm0, %v2821_v28 }
 0x29b   :  { %v2824_v31 = vpop.f32.mrb[8].mxu0  ;;  %3189 = vmatpush3.bf16.msra.mxu0 %v3638_v18 }
 0x29c   :  { %v450_v32 = vpop.f32.mrb[9].mxu0  ;;  %3191 = vmatprep.subr.bf16.mxu0 %v3656_v30 }
 0x29d   :  { %2842 = vmatprep.mubr.msk.f32.mxu1 %vm75_vm0, %v450_v32  ;;  %2862 = vmatprep.mubr.msk.f32.mxu0 %vm75_vm0, %v450_v32 }
 0x29e   :  { %2843 = vmatmul.mubr.msk.f32.gmra.mrb[6].mxu1 %vm75_vm0, %v2824_v31  ;;  %2863 = vmatmul.mubr.msk.f32.gmra.mrb[16].mxu0 %vm75_vm0, %v2824_v31  ;;  %v3746_v31 = vld [vmem:[%s4140_s2 + $0xa8] sm:$0xff] }
 0x29f   :  { %v2827_v33 = vpop.f32.mrb[10].mxu0  ;;  %3193 = vmatpush3.bf16.msra.mxu0 %v3656_v30 }
 0x2a0   :  { %v460_v34 = vpop.f32.mrb[11].mxu0  ;;  %3195 = vmatprep.subr.bf16.mxu0 %v3684_v40 }
 0x2a1   :  { %2845 = vmatprep.mubr.msk.f32.mxu1 %vm75_vm0, %v460_v34  ;;  %2865 = vmatprep.mubr.msk.f32.mxu0 %vm75_vm0, %v460_v34 }
 0x2a2   :  { %2846 = vmatmul.mubr.msk.f32.gmra.mrb[8].mxu1 %vm75_vm0, %v2827_v33  ;;  %2866 = vmatmul.mubr.msk.f32.gmra.mrb[18].mxu0 %vm75_vm0, %v2827_v33 }
 0x2a3   :  { %v2830_v35 = vpop.f32.mrb[12].mxu0  ;;  %3197 = vmatpush3.bf16.msra.mxu0 %v3684_v40 }
 0x2a4   :  { %v470_v36 = vpop.f32.mrb[13].mxu0  ;;  %3199 = vmatprep.subr.bf16.mxu0 %v3694_v43 }
 0x2a5   :  { %2848 = vmatprep.mubr.msk.f32.mxu1 %vm75_vm0, %v470_v36  ;;  %2868 = vmatprep.mubr.msk.f32.mxu0 %vm75_vm0, %v470_v36  ;;  %v3753_v36 = vld [vmem:[%s4140_s2 + $0xa0] sm:$0xff] }
 0x2a6   :  { %2849 = vmatmul.mubr.msk.f32.gmra.mrb[10].mxu1 %vm75_vm0, %v2830_v35  ;;  %2869 = vmatmul.mubr.msk.f32.gmra.mrb[20].mxu0 %vm75_vm0, %v2830_v35 }
 0x2a7   :  { %2887 = vmatprep.mubr.msk.f32.mxu1 %vm75_vm0, %v341_v37  ;;  %3201 = vmatpush3.bf16.msra.mxu0 %v3694_v43 }
 0x36d   :  { %v2841_v48 = vpop.f32.mrb[4].mxu1  ;;  %v2861_v49 = vpop.f32.mrb[14].mxu0 }
 0x36e   :  { %v579_v50 = vadd.f32 %v2841_v48, %v482_v45  ;;  %v696_v51 = vadd.f32 %v2861_v49, %v623_v46  ;;  %v573_v54 = vpop.f32.mrb[5].mxu1  ;;  %v690_v55 = vpop.f32.mrb[15].mxu0 }
 0x36f   :  { %v574_v57 = vadd.f32 %v573_v54, %v482_v45  ;;  %v691_v59 = vadd.f32 %v690_v55, %v623_v46  ;;  %v3764_v55 = vld [vmem:[%s4140_s2 + $0xb8] sm:$0xff] }
 0x370   :  { %v613_v3 = vmul.f32 %v579_v50, %v3707_v47  ;;  %v730_v4 = vmul.f32 %v696_v51, %v3707_v47 }
 0x371   :  { %v612_v5 = vmul.f32 %v574_v57, %v3712_v53  ;;  %v729_v6 = vmul.f32 %v691_v59, %v3712_v53  ;;  %v2844_v8 = vpop.f32.mrb[6].mxu1  ;;  %v2864_v9 = vpop.f32.mrb[16].mxu0 }
 0x372   :  { %v589_v10 = vadd.f32 %v2844_v8, %v482_v45  ;;  %v706_v11 = vadd.f32 %v2864_v9, %v623_v46  ;;  %v583_v13 = vpop.f32.mrb[7].mxu1  ;;  %v700_v15 = vpop.f32.mrb[17].mxu0 }
 0x373   :  { %v3162_v17 = vpack.c.bf16 %v613_v3, %v612_v5  ;;  %v584_v21 = vadd.f32 %v583_v13, %v482_v45  ;;  %v701_v22 = vadd.f32 %v700_v15, %v623_v46  ;;  %v3734_v24 = vpack.c.bf16 %v730_v4, %v729_v6  ;;  %v3769_v5 = vld [vmem:[%s4140_s2 + $0xb0] sm:$0xff] }
 0x374   :  { %v615_v25 = vmul.f32 %v589_v10, %v3721_v7  ;;  %v732_v26 = vmul.f32 %v706_v11, %v3721_v7 }
 0x375   :  { %v614_v28 = vmul.f32 %v584_v21, %v3726_v12  ;;  %v731_v29 = vmul.f32 %v701_v22, %v3726_v12  ;;  %3164 = vmatprep.subr.msk.bf16.mxu1 %vm3730_vm2, %v3162_v17  ;;  %3203 = vmatprep.subr.bf16.mxu0 %v3734_v24  ;;  %v2847_v32 = vpop.f32.mrb[8].mxu1  ;;  %v2867_v33 = vpop.f32.mrb[18].mxu0 }
 0x376   :  { %3167 = vmatpush3.bf16.xpose.msk.msra.mxu1 %vm3730_vm2, %v3162_v17  ;;  %v599_v34 = vadd.f32 %v2847_v32, %v482_v45  ;;  %v716_v35 = vadd.f32 %v2867_v33, %v623_v46  ;;  %v593_v37 = vpop.f32.mrb[9].mxu1  ;;  %v710_v38 = vpop.f32.mrb[19].mxu0 }
 0x377   :  { %v3168_v39 = vpack.c.bf16 %v615_v25, %v614_v28  ;;  %v594_v41 = vadd.f32 %v593_v37, %v482_v45  ;;  %v711_v42 = vadd.f32 %v710_v38, %v623_v46  ;;  %v3206_v48 = vpack.c.bf16 %v732_v26, %v731_v29  ;;  %v3795_v28 = vld [vmem:[%s4140_s2 + $0xc8] sm:$0xff] }
 0x378   :  { %v617_v49 = vmul.f32 %v599_v34, %v3746_v31  ;;  %v734_v50 = vmul.f32 %v716_v35, %v3746_v31 }
 0x379   :  { %3170 = vmatprep.subr.msk.bf16.mxu1 %vm3730_vm2, %v3168_v39  ;;  %v616_v51 = vmul.f32 %v594_v41, %v3753_v36  ;;  %v733_v54 = vmul.f32 %v711_v42, %v3753_v36  ;;  %v2850_v57 = vpop.f32.mrb[10].mxu1  ;;  %v2870_v59 = vpop.f32.mrb[20].mxu0 }
 0x37a   :  { %v609_v3 = vadd.f32 %v2850_v57, %v482_v45  ;;  %v726_v4 = vadd.f32 %v2870_v59, %v623_v46  ;;  %v603_v6 = vpop.f32.mrb[11].mxu1  ;;  %v720_v8 = vpop.f32.mrb[21].mxu0  ;;  %v252_v57 = vld [vmem:[%s4141_s3 + $0x70] sm:$0xff] }
 0x37b   :  { %v3174_v9 = vpack.c.bf16 %v617_v49, %v616_v51  ;;  %v604_v10 = vadd.f32 %v603_v6, %v482_v45  ;;  %v721_v11 = vadd.f32 %v720_v8, %v623_v46  ;;  %v3210_v13 = vpack.c.bf16 %v734_v50, %v733_v54  ;;  %v3790_v45 = vld [vmem:[%s4140_s2 + $0xc0] sm:$0xff]  ;;  %v251_v54 = vld [vmem:[%s4141_s3 + $0x68] sm:$0xff] }
 0x37c   :  { %v619_v15 = vmul.f32 %v609_v3, %v3764_v55  ;;  %v736_v17 = vmul.f32 %v726_v4, %v3764_v55  ;;  %v250_v51 = vld [vmem:[%s4141_s3 + $0x60] sm:$0xff] }
 0x37d   :  { %v618_v21 = vmul.f32 %v604_v10, %v3769_v5  ;;  %v735_v22 = vmul.f32 %v721_v11, %v3769_v5  ;;  %v3218_v59 = vpack.c.bf16 %v251_v54, %v250_v51  ;;  %v255_v54 = vld [vmem:[%s4141_s3 + $0x88] sm:$0xff] }
 0x37e   :  { %3173 = vmatpush3.bf16.xpose.msk.msra.mxu1 %vm3730_vm2, %v3168_v39 }
 0x37f   :  { %3176 = vmatprep.subr.msk.bf16.mxu1 %vm3730_vm2, %v3174_v9  ;;  %v3180_v25 = vpack.c.bf16 %v619_v15, %v618_v21  ;;  %v3214_v26 = vpack.c.bf16 %v736_v17, %v735_v22  ;;  %v1025_v21 = vsub.s32 3, %v3476_v14 }
 0x381   :  { %v1026_v22 = vrot.slane %v3644_v20, %v1025_v21 }
 0x386   :  { %3179 = vmatpush3.bf16.xpose.msk.msra.mxu1 %vm3730_vm2, %v3174_v9 }
 0x387   :  { %3182 = vmatprep.subr.msk.bf16.mxu1 %vm3730_vm2, %v3180_v25 }
 0x38e   :  { %3185 = vmatpush3.bf16.xpose.msk.msra.mxu1 %vm3730_vm2, %v3180_v25 }
 0x38f   :  { %3219 = vmatprep.subr.bf16.mxu1 %v3218_v59 }
 0x395   :  { %2888 = vmatmul.mubr.msk.f32.vlgmr.msra.gmra.mrb[12].mxu1 %vm75_vm0, %v3648_v23 }
 0x396   :  { %3221 = vmatpush3.bf16.msra.mxu1 %v3218_v59  ;;  %v256_v59 = vld [vmem:[%s4141_s3 + $0x90] sm:$0xff] }
 0x468   :  { %v2889_v46 = vpop.f32.mrb[12].mxu1 }
 0x469   :  { %v833_v29 = vpop.f32.mrb[13].mxu1  ;;  %v839_v33 = vadd.f32 %v2889_v46, %v3795_v28 }
 0x46a   :  { %v834_v32 = vadd.f32 %v833_v29, %v3790_v45 }
 0x46b   :  { %v846_v23 = vsel %vm842_vm3, %v839_v33, -inf }
 0x46c   :  { %v843_v34 = vsel %vm842_vm3, %v834_v32, -inf }
 0x46d   :  { %844 = vmax.xlane.f32.xlu0 %v843_v34 }
 0x471   :  { %847 = vmax.xlane.f32.xlu0 %v846_v23 }
 0x4fa   :  { %v845_v35 = vpop.xlane.xlu0 %844 }
 0x4fb   :  { %v849_v37 = vsub.f32 %v834_v32, %v845_v35 }
 0x4fd   :  { %v851_v38 = vmul.f32 1.442695, %v849_v37 }
 0x4fe   :  { %v848_v39 = vpop.xlane.xlu0 %847 }
 0x4ff   :  { %3364 = vpow2.f32 %v851_v38  ;;  %v850_v41 = vsub.f32 %v839_v33, %v848_v39 }
 0x501   :  { %v853_v42 = vmul.f32 1.442695, %v850_v41 }
 0x503   :  { %3366 = vpow2.f32 %v853_v42 }
 0x509   :  { %v3365_v49 = vpop.eup %3364 }
 0x50a   :  { %2906 = vmatprep.mubr.msk.f32.mxu0 %vm842_vm3, %v3365_v49 }
 0x50d   :  { %v3367_v50 = vpop.eup %3366 }
 0x50e   :  { %2907 = vmatmul.mubr.msk.f32.vlgmr.msra.gmra.mrb[22].mxu0 %vm842_vm3, %v3367_v50 }
 0x50f   :  { %3205 = vmatpush3.bf16.msra.mxu0 %v3734_v24  ;;  %v253_v24 = vld [vmem:[%s4141_s3 + $0x78] sm:$0xff] }
 0x510   :  { %3207 = vmatprep.subr.bf16.mxu0 %v3206_v48 }
 0x513   :  { %3209 = vmatpush3.bf16.msra.mxu0 %v3206_v48  ;;  %v3222_v48 = vpack.c.bf16 %v253_v24, %v252_v57  ;;  %v257_v24 = vld [vmem:[%s4141_s3 + $0x98] sm:$0xff] }
 0x514   :  { %3211 = vmatprep.subr.bf16.mxu0 %v3210_v13 }
 0x515   :  { %3223 = vmatprep.subr.bf16.mxu1 %v3222_v48 }
 0x516   :  { %3225 = vmatpush3.bf16.msra.mxu1 %v3222_v48  ;;  %v3230_v48 = vpack.c.bf16 %v257_v24, %v256_v59 }
 0x517   :  { %3213 = vmatpush3.bf16.msra.mxu0 %v3210_v13 }
 0x518   :  { %3215 = vmatprep.subr.bf16.mxu0 %v3214_v26 }
 0x51b   :  { %3217 = vmatpush3.bf16.msra.mxu0 %v3214_v26 }
 0x5e1   :  { %v2908_v3 = vpop.f32.mrb[22].mxu0 }
 0x5e2   :  { %v937_v4 = vmax.f32 %v2908_v3, 1e-30  ;;  %v927_v6 = vpop.f32.mrb[23].mxu0  ;;  %v258_v3 = vld [vmem:[%s4141_s3 + $0xa0] sm:$0xff] }
 0x5e3   :  { %v936_v8 = vmax.f32 %v927_v6, 1e-30 }
 0x5e4   :  { %3368 = vrcp.f32 %v937_v4  ;;  %v259_v4 = vld [vmem:[%s4141_s3 + $0xa8] sm:$0xff] }
 0x5e5   :  { %3370 = vrcp.f32 %v936_v8  ;;  %v3234_v8 = vpack.c.bf16 %v259_v4, %v258_v3 }
 0x5e7   :  { %3236 = vmatprep.subr.msk.bf16.mxu0 %vm3850_vm4, %v3234_v8 }
 0x5ee   :  { %v3369_v9 = vpop.eup %3368 }
 0x5ef   :  { %v3371_v10 = vpop.eup %3370  ;;  %v941_v13 = vmul.f32 %v3369_v9, %v3367_v50  ;;  %v260_v9 = vld [vmem:[%s4141_s3 + $0xb0] sm:$0xff] }
 0x5f0   :  { %v940_v11 = vmul.f32 %v3371_v10, %v3365_v49  ;;  %v261_v10 = vld [vmem:[%s4141_s3 + $0xb8] sm:$0xff] }
 0x5f2   :  { %2925 = vmatprep.mubr.msk.f32.mxu0 %vm842_vm3, %v940_v11  ;;  %v3240_v11 = vpack.c.bf16 %v261_v10, %v260_v9 }
 0x5f3   :  { %2926 = vmatmul.mubr.msk.f32.vlgmr.msra.gmra.mrb[24].mxu0 %vm842_vm3, %v941_v13 }
 0x5f4   :  { %3239 = vmatpush3.bf16.xpose.msk.msra.mxu0 %vm3850_vm4, %v3234_v8 }
 0x5f5   :  { %3242 = vmatprep.subr.msk.bf16.mxu0 %vm3850_vm4, %v3240_v11 }
 0x5fc   :  { %3245 = vmatpush3.bf16.xpose.msk.msra.mxu0 %vm3850_vm4, %v3240_v11 }
 0x6c6   :  { %v2927_v15 = vpop.f32.mrb[24].mxu0 }
 0x6c7   :  { %v1014_v17 = vpop.f32.mrb[25].mxu0 }
 0x6c8   :  { %2936 = vmatprep.mubr.msk.f32.mxu1 %vm75_vm0, %v1014_v17 }
 0x6c9   :  { %2937 = vmatmul.mubr.msk.f32.vlgmr.msra.gmra.mrb[14].mxu1 %vm75_vm0, %v2927_v15 }
 0x79c   :  { %v2938_v25 = vpop.f32.mrb[14].mxu1 }
 0x79d   :  { %v1099_v26 = vpop.f32.mrb[15].mxu1  ;;  %v1105_v46 = vadd.f32 %v2938_v25, %v1026_v22 }
 0x79e   :  { %v1100_v29 = vadd.f32 %v1099_v26, %v1026_v22 }
 0x79f   :  { %v1109_v34 = vadd.f32 %v1105_v46, %v3546_v56  ;;  %v254_v56 = vld [vmem:[%s4141_s3 + $0x80] sm:$0xff]  ;;  %v1139_v46 = vsub.s32 4, %v3476_v14 }
 0x7a0   :  { %v1108_v32 = vadd.f32 %v1100_v29, %v3539_v52  ;;  %v3226_v57 = vpack.c.bf16 %v255_v54, %v254_v56  ;;  %v1145_v29 = vsub.s32 5, %v3476_v14 }
 0x7a1   :  { %v1113_v23 = vsel %vm75_vm0, %v1109_v34, 0.0 }
 0x7a2   :  { %v1110_v33 = vsel %vm75_vm0, %v1108_v32, 0.0  ;;  %3227 = vmatprep.subr.bf16.mxu1 %v3226_v57 }
 0x7a3   :  { %1111 = vadd.xlane.f32.xlu1 %v1110_v33  ;;  %3229 = vmatpush3.bf16.msra.mxu1 %v3226_v57 }
 0x7a4   :  { %3231 = vmatprep.subr.bf16.mxu1 %v3230_v48 }
 0x7a7   :  { %1114 = vadd.xlane.f32.xlu1 %v1113_v23  ;;  %3233 = vmatpush3.bf16.msra.mxu1 %v3230_v48  ;;  %v1146_v23 = vrot.slane %v3644_v20, %v1145_v29 }
 0x830   :  { %v1112_v35 = vpop.xlane.xlu1 %1111 }
 0x831   :  { %v1117_v37 = vmul.f32 0.03125, %v1112_v35 }
 0x833   :  { %v1119_v38 = vsub.f32 %v1108_v32, %v1117_v37  ;;  %v1140_v32 = vrot.slane %v3644_v20, %v1139_v46 }
 0x834   :  { %v1115_v39 = vpop.xlane.xlu1 %1114 }
 0x835   :  { %v1118_v41 = vmul.f32 0.03125, %v1115_v39  ;;  %v1121_v42 = vmul.f32 %v1119_v38, %v1119_v38 }
 0x837   :  { %v1120_v49 = vsub.f32 %v1109_v34, %v1118_v41  ;;  %v1123_v50 = vsel %vm75_vm0, %v1121_v42, 0.0 }
 0x838   :  { %1124 = vadd.xlane.f32.xlu0 %v1123_v50 }
 0x839   :  { %v1122_v51 = vmul.f32 %v1120_v49, %v1120_v49 }
 0x83b   :  { %v1126_v52 = vsel %vm75_vm0, %v1122_v51, 0.0  ;;  %v1151_v51 = vsub.s32 6, %v3476_v14 }
 0x83c   :  { %1127 = vadd.xlane.f32.xlu1 %v1126_v52 }
 0x8c5   :  { %v1125_v13 = vpop.xlane.xlu0 %1124 }
 0x8c6   :  { %v1129_v15 = vmul.f32 0.03125, %v1125_v13 }
 0x8c8   :  { %v1131_v17 = vadd.f32 1e-05, %v1129_v15 }
 0x8c9   :  { %v1128_v22 = vpop.xlane.xlu1 %1127 }
 0x8ca   :  { %3372 = vrsqrt.f32 %v1131_v17  ;;  %v1130_v25 = vmul.f32 0.03125, %v1128_v22 }
 0x8cc   :  { %v1132_v26 = vadd.f32 1e-05, %v1130_v25 }
 0x8ce   :  { %3374 = vrsqrt.f32 %v1132_v26 }
 0x8d4   :  { %v3373_v33 = vpop.eup %3372 }
 0x8d5   :  { %v1135_v34 = vmul.f32 %v3373_v33, %v1119_v38  ;;  %v1152_v38 = vrot.slane %v3644_v20, %v1151_v51 }
 0x8d7   :  { %v1141_v35 = vmul.f32 %v1140_v32, %v1135_v34 }
 0x8d8   :  { %v3375_v37 = vpop.eup %3374 }
 0x8d9   :  { %v1136_v39 = vmul.f32 %v3375_v37, %v1120_v49  ;;  %v1147_v41 = vadd.f32 %v1146_v23, %v1141_v35  ;;  %v1238_v49 = vsub.s32 7, %v3476_v14  ;;  %v2552_v35 = vld [vmem:[%s4141_s3 + $0xd0] sm:$0xff]  ;;  %v2553_v37 = vld [vmem:[%s4141_s3 + $0xd8] sm:$0xff] }
 0x8db   :  { %v1142_v42 = vmul.f32 %v1140_v32, %v1136_v39  ;;  %2947 = vmatprep.mubr.msk.f32.mxu1 %vm75_vm0, %v1147_v41  ;;  %v1239_v48 = vrot.slane %v3644_v20, %v1238_v49  ;;  %v3246_v39 = vpack.c.bf16 %v2553_v37, %v2552_v35 }
 0x8dd   :  { %v1148_v50 = vadd.f32 %v1146_v23, %v1142_v42  ;;  %v2555_v42 = vld [vmem:[%s4141_s3 + $0xe8] sm:$0xff]  ;;  %3247 = vmatprep.subr.bf16.mxu1 %v3246_v39 }
 0x8df   :  { %2948 = vmatmul.mubr.msk.f32.vlgmr.msra.gmra.mrb[16].mxu1 %vm75_vm0, %v1148_v50 }
 0x8e0   :  { %3249 = vmatpush3.bf16.msra.mxu1 %v3246_v39 }
 0x9b2   :  { %v2949_v52 = vpop.f32.mrb[16].mxu1 }
 0x9b3   :  { %v1231_v56 = vadd.f32 %v2949_v52, %v1152_v38  ;;  %v1225_v54 = vpop.f32.mrb[17].mxu1 }
 0x9b4   :  { %v1226_v57 = vadd.f32 %v1225_v54, %v1152_v38 }
 0x9b5   :  { %v1235_v24 = vmax.f32 %v1231_v56, 0.0 }
 0x9b6   :  { %v1234_v59 = vmax.f32 %v1226_v57, 0.0 }
 0x9b8   :  { %2958 = vmatprep.mubr.msk.f32.mxu0 %vm842_vm3, %v1234_v59 }
 0x9b9   :  { %2959 = vmatmul.mubr.msk.f32.vlgmr.msra.gmra.mrb[26].mxu0 %vm842_vm3, %v1235_v24  ;;  %v263_v24 = vld [vmem:[%s4141_s3 + $0xc8] sm:$0x3] }
 0x9ba   :  { %2976 = vmatprep.mubr.msk.f32.mxu0 %vm349_vm1, %v3551_v58 }
 0xa8c   :  { %v2960_v3 = vpop.f32.mrb[26].mxu0 }
 0xa8d   :  { %v1330_v4 = vadd.f32 %v2960_v3, %v1239_v48  ;;  %v1324_v8 = vpop.f32.mrb[27].mxu0 }
 0xa8e   :  { %v1325_v9 = vadd.f32 %v1324_v8, %v1239_v48  ;;  %v1364_v48 = vrot.slane %v263_v24, %v3488_v19 }
 0xa8f   :  { %v1334_v10 = vadd.f32 %v1330_v4, %v1148_v50 }
 0xa90   :  { %v1333_v11 = vadd.f32 %v1325_v9, %v1147_v41  ;;  %v2554_v41 = vld [vmem:[%s4141_s3 + $0xe0] sm:$0xff]  ;;  %v1370_v9 = vrot.slane %v263_v24, %v3501_v27 }
 0xa91   :  { %v1338_v13 = vsel %vm75_vm0, %v1334_v10, 0.0  ;;  %v3250_v50 = vpack.c.bf16 %v2555_v42, %v2554_v41 }
 0xa92   :  { %1339 = vadd.xlane.f32.xlu1 %v1338_v13  ;;  %v1335_v15 = vsel %vm75_vm0, %v1333_v11, 0.0 }
 0xa93   :  { %1336 = vadd.xlane.f32.xlu0 %v1335_v15  ;;  %3251 = vmatprep.subr.bf16.mxu1 %v3250_v50 }
 0xa94   :  { %3253 = vmatpush3.bf16.msra.mxu1 %v3250_v50 }
 0xb1f   :  { %v1340_v17 = vpop.xlane.xlu1 %1339 }
 0xb20   :  { %v1342_v58 = vmul.f32 0.03125, %v1340_v17  ;;  %v1337_v22 = vpop.xlane.xlu0 %1336 }
 0xb21   :  { %v1341_v25 = vmul.f32 0.03125, %v1337_v22  ;;  %v2559_v22 = vld [vmem:[%s4141_s3 + $0x108] sm:$0xff] }
 0xb22   :  { %v1344_v26 = vsub.f32 %v1334_v10, %v1342_v58 }
 0xb23   :  { %v1343_v32 = vsub.f32 %v1333_v11, %v1341_v25  ;;  %v2562_v25 = vld [vmem:[%s4141_s3 + $0x120] sm:$0xff] }
 0xb24   :  { %v1346_v33 = vmul.f32 %v1344_v26, %v1344_v26 }
 0xb25   :  { %v1345_v20 = vmul.f32 %v1343_v32, %v1343_v32 }
 0xb26   :  { %v1350_v34 = vsel %vm75_vm0, %v1346_v33, 0.0 }
 0xb27   :  { %1351 = vadd.xlane.f32.xlu1 %v1350_v34  ;;  %v1347_v23 = vsel %vm75_vm0, %v1345_v20, 0.0  ;;  %v3963_v20 = vld [vmem:[%s4141_s3 + $0x190] sm:$0xff] }
 0xb28   :  { %1348 = vadd.xlane.f32.xlu0 %v1347_v23  ;;  %v1403_v34 = vrot.slane %v3963_v20, %v3488_v19  ;;  %v2255_v6 = vrot.slane %v3963_v20, %v1145_v29  ;;  %v2348_v29 = vrot.slane %v3963_v20, %v1238_v49 }
 0xbb4   :  { %v1352_v38 = vpop.xlane.xlu1 %1351 }
 0xbb5   :  { %v1354_v52 = vmul.f32 0.03125, %v1352_v38  ;;  %v1349_v56 = vpop.xlane.xlu0 %1348 }
 0xbb6   :  { %v1353_v54 = vmul.f32 0.03125, %v1349_v56 }
 0xbb7   :  { %v1356_v57 = vadd.f32 1e-05, %v1354_v52 }
 0xbb8   :  { %v1355_v59 = vadd.f32 1e-05, %v1353_v54 }
 0xbb9   :  { %3376 = vrsqrt.f32 %v1356_v57  ;;  %v1734_v57 = vrot.slane %v3963_v20, %v622_v44 }
 0xbba   :  { %3378 = vrsqrt.f32 %v1355_v59 }
 0xbc3   :  { %v3377_v3 = vpop.eup %3376 }
 0xbc4   :  { %v3379_v4 = vpop.eup %3378  ;;  %v1360_v8 = vmul.f32 %v3377_v3, %v1344_v26 }
 0xbc5   :  { %v1359_v10 = vmul.f32 %v3379_v4, %v1343_v32  ;;  %v2563_v32 = vld [vmem:[%s4141_s3 + $0x128] sm:$0xff] }
 0xbc6   :  { %v1366_v11 = vmul.f32 %v1364_v48, %v1360_v8  ;;  %v3270_v33 = vpack.c.bf16 %v2563_v32, %v2562_v25 }
 0xbc7   :  { %v1365_v13 = vmul.f32 %v1364_v48, %v1359_v10 }
 0xbc8   :  { %v3911_v15 = vadd.f32 %v1370_v9, %v1366_v11 }
 0xbc9   :  { %v3913_v17 = vadd.f32 %v1370_v9, %v1365_v13 }
 0xbcb   :  { %2969 = vmatprep.mubr.msk.f32.mxu1 %vm75_vm0, %v3913_v17  ;;  %v3254_v58 = vpack.c.bf16 %v3911_v15, %v3913_v17 }
 0xbcc   :  { %2970 = vmatmul.mubr.msk.f32.vlgmr.msra.gmra.mrb[18].mxu1 %vm75_vm0, %v3911_v15 }
 0xbcd   :  { %3255 = vmatprep.subr.bf16.mxu0 %v3254_v58  ;;  %3358 = vmatprep.subr.bf16.mxu1 %v3254_v58 }
 0xbce   :  { %3257 = vmatpush3.bf16.msra.mxu0 %v3254_v58  ;;  %3359 = vmatpush3.bf16.msra.mxu1 %v3254_v58 }
 0xbcf   :  { %2982 = vmatprep.mubr.msk.f32.mxu1 %vm349_vm1, %v3581_v63  ;;  %v2556_v63 = vld [vmem:[%s4141_s3 + $0xf0] sm:$0xff] }
 0xbd1   :  { %2977 = vmatmul.mubr.msk.f32.vlgmr.msra.gmra.mrb[28].mxu0 %vm349_vm1, %v3562_v60  ;;  %2983 = vmatmul.mubr.msk.f32.vlgmr.msra.gmra.mrb[20].mxu1 %vm349_vm1, %v3590_v0  ;;  %v2557_v60 = vld [vmem:[%s4141_s3 + $0xf8] sm:$0xff] }
 0xbd2   :  { %2979 = vmatprep.mubr.msk.f32.mxu0 %vm349_vm1, %v3567_v61  ;;  %2985 = vmatprep.mubr.msk.f32.mxu1 %vm349_vm1, %v3595_v1  ;;  %v2560_v61 = vld [vmem:[%s4141_s3 + $0x110] sm:$0xff]  ;;  %v3258_v0 = vpack.c.bf16 %v2557_v60, %v2556_v63 }
 0xbd4   :  { %3259 = vmatprep.subr.bf16.mxu0 %v3258_v0 }
 0xbd5   :  { %2980 = vmatmul.mubr.msk.f32.gmra.mrb[30].mxu0 %vm349_vm1, %v3576_v62  ;;  %2986 = vmatmul.mubr.msk.f32.gmra.mrb[22].mxu1 %vm349_vm1, %v3604_v2  ;;  %v2561_v62 = vld [vmem:[%s4141_s3 + $0x118] sm:$0xff]  ;;  %v2558_v2 = vld [vmem:[%s4141_s3 + $0x100] sm:$0xff] }
 0xbd6   :  { %v3266_v1 = vpack.c.bf16 %v2561_v62, %v2560_v61  ;;  %3261 = vmatpush3.bf16.msra.mxu0 %v3258_v0  ;;  %v3262_v26 = vpack.c.bf16 %v2559_v22, %v2558_v2 }
 0xbd8   :  { %3267 = vmatprep.subr.bf16.mxu1 %v3266_v1  ;;  %3263 = vmatprep.subr.bf16.mxu0 %v3262_v26 }
 0xbd9   :  { %3269 = vmatpush3.bf16.msra.mxu1 %v3266_v1 }
 0xbda   :  { %3271 = vmatprep.subr.bf16.mxu1 %v3270_v33  ;;  %3265 = vmatpush3.bf16.msra.mxu0 %v3262_v26 }
 0xbdd   :  { %3273 = vmatpush3.bf16.msra.mxu1 %v3270_v33 }
 0xbde   :  { %3299 = vmatprep.subr.bf16.mxu1 %v3638_v18 }
 0xc9f   :  { %v2971_v23 = vpop.f32.mrb[18].mxu1 }
 0xca0   :  { %v3967_v35 = vadd.f32 %v2971_v23, %v1403_v34  ;;  %v1476_v37 = vpop.f32.mrb[19].mxu1 }
 0xca4   :  { %v2978_v39 = vpop.f32.mrb[28].mxu0  ;;  %v2984_v41 = vpop.f32.mrb[20].mxu1 }
 0xca5   :  { %v1551_v42 = vpop.f32.mrb[29].mxu0  ;;  %v1571_v50 = vpop.f32.mrb[21].mxu1 }
 0xca6   :  { %2996 = vmatprep.mubr.msk.f32.mxu0 %vm75_vm0, %v1551_v42  ;;  %3016 = vmatprep.mubr.msk.f32.mxu1 %vm75_vm0, %v1551_v42 }
 0xca7   :  { %2997 = vmatmul.mubr.msk.f32.vlgmr.msra.gmra.mrb[32].mxu0 %vm75_vm0, %v2978_v39  ;;  %3017 = vmatmul.mubr.msk.f32.vlgmr.msra.gmra.mrb[24].mxu1 %vm75_vm0, %v2978_v39 }
 0xca8   :  { %v2981_v38 = vpop.f32.mrb[30].mxu0  ;;  %v2987_v52 = vpop.f32.mrb[22].mxu1  ;;  %3301 = vmatpush3.bf16.msra.mxu1 %v3638_v18  ;;  %v1477_v18 = vadd.f32 %v1476_v37, %v1403_v34 }
 0xca9   :  { %v1561_v56 = vpop.f32.mrb[31].mxu0  ;;  %v1581_v54 = vpop.f32.mrb[23].mxu1  ;;  %3303 = vmatprep.subr.bf16.mxu1 %v3656_v30 }
 0xcaa   :  { %2999 = vmatprep.mubr.msk.f32.mxu0 %vm75_vm0, %v1561_v56  ;;  %3019 = vmatprep.mubr.msk.f32.mxu1 %vm75_vm0, %v1561_v56 }
 0xcab   :  { %3000 = vmatmul.mubr.msk.f32.gmra.mrb[34].mxu0 %vm75_vm0, %v2981_v38  ;;  %3020 = vmatmul.mubr.msk.f32.gmra.mrb[26].mxu1 %vm75_vm0, %v2981_v38 }
 0xcac   :  { %3002 = vmatprep.mubr.msk.f32.mxu0 %vm75_vm0, %v1571_v50  ;;  %3022 = vmatprep.mubr.msk.f32.mxu1 %vm75_vm0, %v1571_v50 }
 0xcad   :  { %3305 = vmatpush3.bf16.msra.mxu1 %v3656_v30  ;;  %v1593_v30 = vrot.slane %v3963_v20, %v3501_v27 }
 0xcae   :  { %3307 = vmatprep.subr.bf16.mxu1 %v3684_v40 }
 0xcaf   :  { %3003 = vmatmul.mubr.msk.f32.gmra.mrb[36].mxu0 %vm75_vm0, %v2984_v41  ;;  %3023 = vmatmul.mubr.msk.f32.gmra.mrb[28].mxu1 %vm75_vm0, %v2984_v41 }
 0xcb0   :  { %3005 = vmatprep.mubr.msk.f32.mxu0 %vm75_vm0, %v1581_v54  ;;  %3025 = vmatprep.mubr.msk.f32.mxu1 %vm75_vm0, %v1581_v54 }
 0xcb1   :  { %3309 = vmatpush3.bf16.msra.mxu1 %v3684_v40 }
 0xcb2   :  { %3311 = vmatprep.subr.bf16.mxu1 %v3694_v43 }
 0xcb3   :  { %3006 = vmatmul.mubr.msk.f32.gmra.mrb[38].mxu0 %vm75_vm0, %v2987_v52  ;;  %3026 = vmatmul.mubr.msk.f32.gmra.mrb[30].mxu1 %vm75_vm0, %v2987_v52 }
 0xcb4   :  { %3044 = vmatprep.mubr.msk.f32.mxu0 %vm75_vm0, %v1477_v18 }
 0xcb5   :  { %3313 = vmatpush3.bf16.msra.mxu1 %v3694_v43 }
 0xd7a   :  { %v2998_v59 = vpop.f32.mrb[32].mxu0  ;;  %v3018_v40 = vpop.f32.mrb[24].mxu1 }
 0xd7b   :  { %v1690_v24 = vadd.f32 %v2998_v59, %v1593_v30  ;;  %v1807_v48 = vadd.f32 %v3018_v40, %v1734_v57  ;;  %v1684_v3 = vpop.f32.mrb[33].mxu0  ;;  %v1801_v4 = vpop.f32.mrb[25].mxu1 }
 0xd7c   :  { %v1685_v8 = vadd.f32 %v1684_v3, %v1593_v30  ;;  %v1802_v9 = vadd.f32 %v1801_v4, %v1734_v57 }
 0xd7d   :  { %v1724_v10 = vmul.f32 %v1690_v24, %v3707_v47  ;;  %v1841_v11 = vmul.f32 %v1807_v48, %v3707_v47 }
 0xd7e   :  { %v1723_v43 = vmul.f32 %v1685_v8, %v3712_v53  ;;  %v1840_v13 = vmul.f32 %v1802_v9, %v3712_v53  ;;  %v3001_v58 = vpop.f32.mrb[34].mxu0  ;;  %v3021_v63 = vpop.f32.mrb[26].mxu1 }
 0xd7f   :  { %v1700_v60 = vadd.f32 %v3001_v58, %v1593_v30  ;;  %v1817_v44 = vadd.f32 %v3021_v63, %v1734_v57  ;;  %v1694_v61 = vpop.f32.mrb[35].mxu0  ;;  %v1811_v0 = vpop.f32.mrb[27].mxu1 }
 0xd80   :  { %v3274_v62 = vpack.c.bf16 %v1724_v10, %v1723_v43  ;;  %v1695_v1 = vadd.f32 %v1694_v61, %v1593_v30  ;;  %v1812_v2 = vadd.f32 %v1811_v0, %v1734_v57  ;;  %v4002_v22 = vpack.c.bf16 %v1841_v11, %v1840_v13 }
 0xd81   :  { %v1726_v25 = vmul.f32 %v1700_v60, %v3721_v7  ;;  %v1843_v26 = vmul.f32 %v1817_v44, %v3721_v7 }
 0xd82   :  { %v1725_v47 = vmul.f32 %v1695_v1, %v3726_v12  ;;  %v1842_v32 = vmul.f32 %v1812_v2, %v3726_v12  ;;  %3276 = vmatprep.subr.msk.bf16.mxu0 %vm3730_vm2, %v3274_v62  ;;  %3315 = vmatprep.subr.bf16.mxu1 %v4002_v22  ;;  %v3004_v53 = vpop.f32.mrb[36].mxu0  ;;  %v3024_v33 = vpop.f32.mrb[28].mxu1  ;;  %v2566_v2 = vld [vmem:[%s4141_s3 + $0x140] sm:$0xff] }
 0xd83   :  { %3279 = vmatpush3.bf16.xpose.msk.msra.mxu0 %vm3730_vm2, %v3274_v62  ;;  %v1710_v34 = vadd.f32 %v3004_v53, %v1593_v30  ;;  %v1827_v23 = vadd.f32 %v3024_v33, %v1734_v57  ;;  %v1704_v37 = vpop.f32.mrb[37].mxu0  ;;  %v1821_v39 = vpop.f32.mrb[29].mxu1 }
 0xd84   :  { %v3280_v41 = vpack.c.bf16 %v1726_v25, %v1725_v47  ;;  %v1705_v7 = vadd.f32 %v1704_v37, %v1593_v30  ;;  %v1822_v42 = vadd.f32 %v1821_v39, %v1734_v57  ;;  %v3318_v50 = vpack.c.bf16 %v1843_v26, %v1842_v32 }
 0xd85   :  { %v1728_v12 = vmul.f32 %v1710_v34, %v3746_v31  ;;  %v1845_v38 = vmul.f32 %v1827_v23, %v3746_v31 }
 0xd86   :  { %3282 = vmatprep.subr.msk.bf16.mxu0 %vm3730_vm2, %v3280_v41  ;;  %v1727_v52 = vmul.f32 %v1705_v7, %v3753_v36  ;;  %v1844_v56 = vmul.f32 %v1822_v42, %v3753_v36  ;;  %v3007_v54 = vpop.f32.mrb[38].mxu0  ;;  %v3027_v18 = vpop.f32.mrb[30].mxu1  ;;  %v2136_v42 = vrot.slane %v3963_v20, %v1025_v21 }
 0xd87   :  { %v1720_v59 = vadd.f32 %v3007_v54, %v1593_v30  ;;  %v1837_v40 = vadd.f32 %v3027_v18, %v1734_v57  ;;  %v1714_v24 = vpop.f32.mrb[39].mxu0  ;;  %v1831_v48 = vpop.f32.mrb[31].mxu1 }
 0xd88   :  { %v3286_v3 = vpack.c.bf16 %v1728_v12, %v1727_v52  ;;  %v1715_v4 = vadd.f32 %v1714_v24, %v1593_v30  ;;  %v1832_v8 = vadd.f32 %v1831_v48, %v1734_v57  ;;  %v3322_v9 = vpack.c.bf16 %v1845_v38, %v1844_v56 }
 0xd89   :  { %v1730_v10 = vmul.f32 %v1720_v59, %v3764_v55  ;;  %v1847_v31 = vmul.f32 %v1837_v40, %v3764_v55 }
 0xd8a   :  { %v1729_v11 = vmul.f32 %v1715_v4, %v3769_v5  ;;  %v1846_v43 = vmul.f32 %v1832_v8, %v3769_v5 }
 0xd8b   :  { %3285 = vmatpush3.bf16.xpose.msk.msra.mxu0 %vm3730_vm2, %v3280_v41 }
 0xd8c   :  { %3288 = vmatprep.subr.msk.bf16.mxu0 %vm3730_vm2, %v3286_v3  ;;  %v3292_v36 = vpack.c.bf16 %v1730_v10, %v1729_v11  ;;  %v3326_v13 = vpack.c.bf16 %v1847_v31, %v1846_v43  ;;  %v2569_v31 = vld [vmem:[%s4141_s3 + $0x158] sm:$0xff]  ;;  %v2570_v43 = vld [vmem:[%s4141_s3 + $0x160] sm:$0xff] }
 0xd93   :  { %3291 = vmatpush3.bf16.xpose.msk.msra.mxu0 %vm3730_vm2, %v3286_v3 }
 0xd94   :  { %3294 = vmatprep.subr.msk.bf16.mxu0 %vm3730_vm2, %v3292_v36 }
 0xd9b   :  { %3297 = vmatpush3.bf16.xpose.msk.msra.mxu0 %vm3730_vm2, %v3292_v36  ;;  %v2571_v36 = vld [vmem:[%s4141_s3 + $0x168] sm:$0xff] }
 0xda2   :  { %3045 = vmatmul.mubr.msk.f32.vlgmr.msra.gmra.mrb[40].mxu0 %vm75_vm0, %v3967_v35 }
 0xe75   :  { %v3046_v55 = vpop.f32.mrb[40].mxu0 }
 0xe76   :  { %v1950_v5 = vadd.f32 %v3046_v55, %v3795_v28  ;;  %v1944_v30 = vpop.f32.mrb[41].mxu0  ;;  %v2565_v28 = vld [vmem:[%s4141_s3 + $0x138] sm:$0xff]  ;;  %v2572_v55 = vld [vmem:[%s4141_s3 + $0x170] sm:$0xff] }
 0xe77   :  { %v1945_v57 = vadd.f32 %v1944_v30, %v3790_v45  ;;  %v2564_v45 = vld [vmem:[%s4141_s3 + $0x130] sm:$0xff]  ;;  %v2574_v30 = vld [vmem:[%s4141_s3 + $0x180] sm:$0xff] }
 0xe78   :  { %v1956_v58 = vsel %vm842_vm3, %v1950_v5, -inf  ;;  %v3330_v25 = vpack.c.bf16 %v2565_v28, %v2564_v45 }
 0xe79   :  { %1957 = vmax.xlane.f32.xlu1 %v1956_v58  ;;  %v1953_v63 = vsel %vm842_vm3, %v1945_v57, -inf  ;;  %v2575_v58 = vld [vmem:[%s4141_s3 + $0x188] sm:$0xff] }
 0xe7a   :  { %1954 = vmax.xlane.f32.xlu0 %v1953_v63  ;;  %3331 = vmatprep.subr.bf16.mxu0 %v3330_v25  ;;  %v3352_v63 = vpack.c.bf16 %v2575_v58, %v2574_v30 }
 0xe7b   :  { %3333 = vmatpush3.bf16.msra.mxu0 %v3330_v25 }
 0xf06   :  { %v1958_v60 = vpop.xlane.xlu1 %1957 }
 0xf07   :  { %v1960_v44 = vsub.f32 %v1950_v5, %v1958_v60  ;;  %v1955_v61 = vpop.xlane.xlu0 %1954  ;;  %v2573_v5 = vld [vmem:[%s4141_s3 + $0x178] sm:$0xff] }
 0xf08   :  { %v1959_v16 = vsub.f32 %v1945_v57, %v1955_v61  ;;  %v3346_v57 = vpack.c.bf16 %v2573_v5, %v2572_v55 }
 0xf09   :  { %v1963_v0 = vmul.f32 1.442695, %v1960_v44 }
 0xf0a   :  { %v1961_v62 = vmul.f32 1.442695, %v1959_v16 }
 0xf0c   :  { %3380 = vpow2.f32 %v1961_v62 }
 0xf0d   :  { %3382 = vpow2.f32 %v1963_v0 }
 0xf16   :  { %v3381_v35 = vpop.eup %3380 }
 0xf17   :  { %v3383_v1 = vpop.eup %3382  ;;  %3063 = vmatprep.mubr.msk.f32.mxu1 %vm842_vm3, %v3381_v35 }
 0xf18   :  { %3064 = vmatmul.mubr.msk.f32.vlgmr.msra.gmra.mrb[32].mxu1 %vm842_vm3, %v3383_v1 }
 0xf19   :  { %3317 = vmatpush3.bf16.msra.mxu1 %v4002_v22  ;;  %v2567_v22 = vld [vmem:[%s4141_s3 + $0x148] sm:$0xff] }
 0xf1a   :  { %3319 = vmatprep.subr.bf16.mxu1 %v3318_v50  ;;  %v3334_v26 = vpack.c.bf16 %v2567_v22, %v2566_v2 }
 0xf1c   :  { %3335 = vmatprep.subr.bf16.mxu0 %v3334_v26 }
 0xf1d   :  { %3321 = vmatpush3.bf16.msra.mxu1 %v3318_v50  ;;  %3337 = vmatpush3.bf16.msra.mxu0 %v3334_v26 }
 0xf1e   :  { %3323 = vmatprep.subr.bf16.mxu1 %v3322_v9 }
 0xf21   :  { %3325 = vmatpush3.bf16.msra.mxu1 %v3322_v9 }
 0xf22   :  { %3327 = vmatprep.subr.bf16.mxu1 %v3326_v13 }
 0xf25   :  { %3329 = vmatpush3.bf16.msra.mxu1 %v3326_v13  ;;  %v3342_v13 = vpack.c.bf16 %v2571_v36, %v2570_v43 }
 0xf26   :  { %3348 = vmatprep.subr.msk.bf16.mxu1 %vm3850_vm4, %v3346_v57 }
 0xfeb   :  { %v3065_v47 = vpop.f32.mrb[32].mxu1 }
 0xfec   :  { %v2047_v32 = vmax.f32 %v3065_v47, 1e-30  ;;  %v2037_v53 = vpop.f32.mrb[33].mxu1 }
 0xfed   :  { %v2046_v33 = vmax.f32 %v2037_v53, 1e-30 }
 0xfee   :  { %3384 = vrcp.f32 %v2047_v32 }
 0xfef   :  { %3386 = vrcp.f32 %v2046_v33 }
 0xff8   :  { %v3385_v34 = vpop.eup %3384 }
 0xff9   :  { %v3387_v23 = vpop.eup %3386  ;;  %v2051_v39 = vmul.f32 %v3385_v34, %v3383_v1 }
 0xffa   :  { %v2050_v37 = vmul.f32 %v3387_v23, %v3381_v35  ;;  %v2249_v35 = vrot.slane %v3963_v20, %v1139_v46  ;;  %v2261_v46 = vrot.slane %v3963_v20, %v1151_v51 }
 0xffc   :  { %3082 = vmatprep.mubr.msk.f32.mxu1 %vm842_vm3, %v2050_v37 }
 0xffd   :  { %3083 = vmatmul.mubr.msk.f32.vlgmr.msra.gmra.mrb[34].mxu1 %vm842_vm3, %v2051_v39 }
 0xffe   :  { %3351 = vmatpush3.bf16.xpose.msk.msra.mxu1 %vm3850_vm4, %v3346_v57 }
 0xfff   :  { %3354 = vmatprep.subr.msk.bf16.mxu1 %vm3850_vm4, %v3352_v63 }
0x1006   :  { %3357 = vmatpush3.bf16.xpose.msk.msra.mxu1 %vm3850_vm4, %v3352_v63 }
0x10d0   :  { %v3084_v41 = vpop.f32.mrb[34].mxu1 }
0x10d1   :  { %v2124_v7 = vpop.f32.mrb[35].mxu1 }
0x10d2   :  { %3093 = vmatprep.mubr.msk.f32.mxu0 %vm75_vm0, %v2124_v7 }
0x10d3   :  { %3094 = vmatmul.mubr.msk.f32.vlgmr.msra.gmra.mrb[42].mxu0 %vm75_vm0, %v3084_v41 }
0x11a6   :  { %v3095_v50 = vpop.f32.mrb[42].mxu0 }
0x11a7   :  { %v2215_v12 = vadd.f32 %v3095_v50, %v2136_v42  ;;  %v2209_v38 = vpop.f32.mrb[43].mxu0 }
0x11a8   :  { %v2210_v52 = vadd.f32 %v2209_v38, %v2136_v42 }
0x11a9   :  { %v2219_v56 = vadd.f32 %v2215_v12, %v3911_v15 }
0x11aa   :  { %v2218_v54 = vadd.f32 %v2210_v52, %v3913_v17  ;;  %v2568_v17 = vld [vmem:[%s4141_s3 + $0x150] sm:$0xff] }
0x11ab   :  { %v2223_v18 = vsel %vm75_vm0, %v2219_v56, 0.0  ;;  %v3338_v11 = vpack.c.bf16 %v2569_v31, %v2568_v17 }
0x11ac   :  { %2224 = vadd.xlane.f32.xlu1 %v2223_v18  ;;  %v2220_v59 = vsel %vm75_vm0, %v2218_v54, 0.0 }
0x11ad   :  { %2221 = vadd.xlane.f32.xlu0 %v2220_v59  ;;  %3339 = vmatprep.subr.bf16.mxu0 %v3338_v11 }
0x11ae   :  { %3341 = vmatpush3.bf16.msra.mxu0 %v3338_v11 }
0x11af   :  { %3343 = vmatprep.subr.bf16.mxu0 %v3342_v13 }
0x11b2   :  { %3345 = vmatpush3.bf16.msra.mxu0 %v3342_v13 }
0x1239   :  { %v2225_v40 = vpop.xlane.xlu1 %2224 }
0x123a   :  { %v2227_v24 = vmul.f32 0.03125, %v2225_v40  ;;  %v2222_v48 = vpop.xlane.xlu0 %2221 }
0x123b   :  { %v2226_v3 = vmul.f32 0.03125, %v2222_v48 }
0x123c   :  { %v2229_v4 = vsub.f32 %v2219_v56, %v2227_v24 }
0x123d   :  { %v2228_v21 = vsub.f32 %v2218_v54, %v2226_v3 }
0x123e   :  { %v2231_v8 = vmul.f32 %v2229_v4, %v2229_v4 }
0x123f   :  { %v2230_v9 = vmul.f32 %v2228_v21, %v2228_v21 }
0x1240   :  { %v2235_v10 = vsel %vm75_vm0, %v2231_v8, 0.0 }
0x1241   :  { %2236 = vadd.xlane.f32.xlu1 %v2235_v10  ;;  %v2232_v15 = vsel %vm75_vm0, %v2230_v9, 0.0  ;;  %v2577_v10 = vld [vmem:[%s4141_s3 + $0x198] sm:$0x3]  ;;  %s3396_s3 = scalar_lea.vmem %s2490_s20, 256 }
0x1242   :  { %2233 = vadd.xlane.f32.xlu0 %v2232_v15  ;;  %v2473_v15 = vrot.slane %v2577_v10, %v3488_v19  ;;  %v2479_v43 = vrot.slane %v2577_v10, %v3501_v27  ;;  %p3397_p0 = scmp.ne.s32.totalorder %s2490_s20, %s3396_s3  ;;  %p3402_p2 = scmp.lt.s32.totalorder %s3396_s3, %s3396_s3 }
0x1244   :  { %p3403_p3 = por %p3402_p2, %p3401_p1 }
0x1246   :  { %p3404_p4 = pnand %p3403_p3, %p3397_p0 }
0x12ce   :  { %v2237_v60 = vpop.xlane.xlu1 %2236 }
0x12cf   :  { %v2239_v44 = vmul.f32 0.03125, %v2237_v60  ;;  %v2234_v61 = vpop.xlane.xlu0 %2233 }
0x12d0   :  { %v2238_v16 = vmul.f32 0.03125, %v2234_v61 }
0x12d1   :  { %v2241_v0 = vadd.f32 1e-05, %v2239_v44 }
0x12d2   :  { %v2240_v62 = vadd.f32 1e-05, %v2238_v16 }
0x12d3   :  { %3388 = vrsqrt.f32 %v2241_v0 }
0x12d4   :  { %3390 = vrsqrt.f32 %v2240_v62 }
0x12dd   :  { %v3389_v1 = vpop.eup %3388 }
0x12de   :  { %v3391_v45 = vpop.eup %3390  ;;  %v2245_v28 = vmul.f32 %v3389_v1, %v2229_v4 }
0x12df   :  { %v2244_v2 = vmul.f32 %v3391_v45, %v2228_v21 }
0x12e0   :  { %v2251_v25 = vmul.f32 %v2249_v35, %v2245_v28 }
0x12e1   :  { %v2250_v22 = vmul.f32 %v2249_v35, %v2244_v2 }
0x12e2   :  { %v2257_v47 = vadd.f32 %v2255_v6, %v2251_v25 }
0x12e3   :  { %v2256_v26 = vadd.f32 %v2255_v6, %v2250_v22 }
0x12e5   :  { %3104 = vmatprep.mubr.msk.f32.mxu0 %vm75_vm0, %v2256_v26 }
0x12e6   :  { %3105 = vmatmul.mubr.msk.f32.vlgmr.msra.gmra.mrb[44].mxu0 %vm75_vm0, %v2257_v47 }
0x13b9   :  { %v3106_v32 = vpop.f32.mrb[44].mxu0 }
0x13ba   :  { %v2340_v53 = vadd.f32 %v3106_v32, %v2261_v46  ;;  %v2334_v33 = vpop.f32.mrb[45].mxu0 }
0x13bb   :  { %v2335_v34 = vadd.f32 %v2334_v33, %v2261_v46 }
0x13bc   :  { %v2344_v37 = vmax.f32 %v2340_v53, 0.0 }
0x13bd   :  { %v2343_v23 = vmax.f32 %v2335_v34, 0.0 }
0x13bf   :  { %3115 = vmatprep.mubr.msk.f32.mxu1 %vm842_vm3, %v2343_v23 }
0x13c0   :  { %3116 = vmatmul.mubr.msk.f32.vlgmr.msra.gmra.mrb[36].mxu1 %vm842_vm3, %v2344_v37 }
0x1493   :  { %v3117_v39 = vpop.f32.mrb[36].mxu1 }
0x1494   :  { %v2439_v41 = vadd.f32 %v3117_v39, %v2348_v29  ;;  %v2433_v7 = vpop.f32.mrb[37].mxu1 }
0x1495   :  { %v2434_v42 = vadd.f32 %v2433_v7, %v2348_v29 }
0x1496   :  { %v2443_v50 = vadd.f32 %v2439_v41, %v2257_v47 }
0x1497   :  { %v2442_v51 = vadd.f32 %v2434_v42, %v2256_v26 }
0x1498   :  { %v2447_v12 = vsel %vm75_vm0, %v2443_v50, 0.0 }
0x1499   :  { %2448 = vadd.xlane.f32.xlu1 %v2447_v12  ;;  %v2444_v38 = vsel %vm75_vm0, %v2442_v51, 0.0 }
0x149a   :  { %2445 = vadd.xlane.f32.xlu0 %v2444_v38 }
0x1526   :  { %v2449_v52 = vpop.xlane.xlu1 %2448 }
0x1527   :  { %v2451_v56 = vmul.f32 0.03125, %v2449_v52  ;;  %v2446_v54 = vpop.xlane.xlu0 %2445 }
0x1528   :  { %v2450_v18 = vmul.f32 0.03125, %v2446_v54 }
0x1529   :  { %v2453_v59 = vsub.f32 %v2443_v50, %v2451_v56 }
0x152a   :  { %v2452_v14 = vsub.f32 %v2442_v51, %v2450_v18 }
0x152b   :  { %v2455_v40 = vmul.f32 %v2453_v59, %v2453_v59 }
0x152c   :  { %v2454_v49 = vmul.f32 %v2452_v14, %v2452_v14 }
0x152d   :  { %v2459_v20 = vsel %vm75_vm0, %v2455_v40, 0.0 }
0x152e   :  { %2460 = vadd.xlane.f32.xlu1 %v2459_v20  ;;  %v2456_v24 = vsel %vm75_vm0, %v2454_v49, 0.0 }
0x152f   :  { %2457 = vadd.xlane.f32.xlu0 %v2456_v24 }
0x15bb   :  { %v2461_v48 = vpop.xlane.xlu1 %2460 }
0x15bc   :  { %v2463_v3 = vmul.f32 0.03125, %v2461_v48  ;;  %v2458_v4 = vpop.xlane.xlu0 %2457 }
0x15bd   :  { %v2462_v21 = vmul.f32 0.03125, %v2458_v4 }
0x15be   :  { %v2465_v8 = vadd.f32 1e-05, %v2463_v3 }
0x15bf   :  { %v2464_v9 = vadd.f32 1e-05, %v2462_v21 }
0x15c0   :  { %3392 = vrsqrt.f32 %v2465_v8 }
0x15c1   :  { %3394 = vrsqrt.f32 %v2464_v9 }
0x15ca   :  { %v3393_v17 = vpop.eup %3392 }
0x15cb   :  { %v3395_v31 = vpop.eup %3394  ;;  %v2469_v11 = vmul.f32 %v3393_v17, %v2453_v59 }
0x15cc   :  { %v2468_v36 = vmul.f32 %v3395_v31, %v2452_v14 }
0x15cd   :  { %v2475_v13 = vmul.f32 %v2473_v15, %v2469_v11 }
0x15ce   :  { %v2474_v55 = vmul.f32 %v2473_v15, %v2468_v36 }
0x15cf   :  { %v2481_v5 = vadd.f32 %v2479_v43, %v2475_v13 }
0x15d0   :  { %v2480_v30 = vadd.f32 %v2479_v43, %v2474_v55 }
0x15d1   :  { %2483 = vst.msk [vmem:[#allocation2 + $0x8] sm:$0xff] %vm75_vm0, %v2481_v5 }
0x15d2   :  { %2482 = vst.msk [vmem:[#allocation2] sm:$0xff] %vm75_vm0, %v2480_v30 }
0x15d3   :  { %3407 = shalt.err (!%p3404_p4)
}
0x15d4   :  { %s3408_s23 = scalar_lea.hbm %s4142_s4, 256 }
0x15d5   :  { %p3409_p5 = scmp.ne.s32.totalorder %s4142_s4, %s3408_s23  ;;  %p3412_p6 = scmp.lt.u32.totalorder %s3408_s23, %s4142_s4 }
0x15d7   :  { %p3414_p7 = pnand %p3412_p6, %p3409_p5 }
0x15d9   :  { %3417 = shalt.err (!%p3414_p7)
}
0x15da   :  { %s3422_s2 = smov 128   ;;  %s3423_s28 = smov 8  }
0x15db   :  { %2495 = dma.vmem_to_hbm [thread:$0]  %s2490_s20, 256, %s4142_s4, [#allocation3], %s3422_s2, %s3422_s2, %s3423_s28  }
0x15dc   :  { %3418 = dma.done.wait [#allocation3], 256  }
0x15dd   :  { %3419 = vsyncadd [#allocation3], 4294967040 }
0x15de   :  { %2499 = vsyncpa [#allocation3], 1 }

</bundles_post_ra>
